<compile_context>
chip_gen: v7x
topology: tpu7x:2x2x1
jax: 0.10.0
libtpu: 0.0.40
codegen_flags: <defaults>
</compile_context>

<pallas_src>
import functools
import math

import jax
import jax.numpy as jnp
from jax.experimental import pallas as pl
from jax.experimental.pallas import tpu as pltpu

LANE = 128          # TPU lane width (final output dim padded to this)
C1_OUT_PAD = 64     # conv1: 32 real output channels padded to 64 -> conv2 lanes = 2*64 = 128
NB_TARGET = 8       # target images folded into one grid step / matmul M dimension


def _round_up(x, m):
    return ((x + m - 1) // m) * m


def _conv_out(size, k, s):
    return (size - k) // s + 1


def _pick_batch_block(B, target=NB_TARGET):
    """Images per grid step: as large as `target`, but keep >= 2 grid steps when B >= 2
    so both v7x TensorCores get work (neutral on v5e/v6e, which have one TC)."""
    nb = max(1, min(target, B))
    while nb > 1 and -(-B // nb) < 2:
        nb //= 2
    return max(nb, 1)


# ------------------------------- conv kernel -------------------------------- #
def _conv_relu_kernel(x_ref, w_ref, b_ref, o_ref, *, kh, n_q, stride, Ho, Wo, Wo8):
    """NB images per grid step.
    x_ref: (NB, H, Wq, s*Cin)      NHWC input, W-stride folded into lanes (f32/bf16)
    w_ref: (kh*n_q, s*Cin, Cout)   bf16 per-tap weight matrices (zero-padded)
    b_ref: (1, Cout)               f32 bias (zero-padded)
    o_ref: (NB, Ho, Wo, Cout)      bf16 NHWC output
    Per output row: kh*n_q MXU matmuls with M = NB*Wo8 (Wo8 is Wo rounded up to 8 so
    the (NB, Wo8) -> NB*Wo8 collapse stays sublane-tile aligned); f32 accumulation.
    """
    NB = o_ref.shape[0]
    cout = o_ref.shape[-1]
    bias = b_ref[...]                                        # (1, Cout) f32

    def row(i, carry):
        h0 = i * stride
        acc = jnp.zeros((NB * Wo8, cout), jnp.float32)
        for dh in range(kh):                                 # small static tap loops
            for q in range(n_q):
                tap = x_ref[:, pl.ds(h0 + dh, 1), pl.ds(q, Wo8), :]   # (NB,1,Wo8,s*Cin)
                tap = tap.reshape(NB * Wo8, tap.shape[-1]).astype(jnp.bfloat16)
                acc = acc + jnp.dot(tap, w_ref[dh * n_q + q],
                                    preferred_element_type=jnp.float32)
        res = jnp.maximum(acc + bias, 0.0).reshape(NB, Wo8, cout)[:, :Wo]
        o_ref[:, pl.ds(i, 1)] = res[:, None, :, :].astype(o_ref.dtype)
        return carry

    jax.lax.fori_loop(0, Ho, row, 0)


def conv2d_relu(x, w_taps, bias, *, kh, kw, stride):
    """NHWC valid conv + ReLU (bf16 output). x: (B, H, W, Cin)."""
    B, H, W, Cin = x.shape
    Ho = _conv_out(H, kh, stride)
    Wo = _conv_out(W, kw, stride)
    n_q = -(-kw // stride)                                   # ceil(kw / stride)
    Wo8 = _round_up(Wo, 8)
    Wp = max(_round_up(W, stride), stride * (Wo8 + n_q - 1))
    if Wp != W:
        x = jnp.pad(x, ((0, 0), (0, 0), (0, Wp - W), (0, 0)))
    xr = x.reshape(B, H, Wp // stride, stride * Cin)         # free reshape: stride -> lanes

    NB = _pick_batch_block(B)
    Bp = _round_up(B, NB)
    if Bp != B:
        xr = jnp.pad(xr, ((0, Bp - B), (0, 0), (0, 0), (0, 0)))

    cout = w_taps.shape[-1]
    kernel = functools.partial(_conv_relu_kernel, kh=kh, n_q=n_q, stride=stride,
                               Ho=Ho, Wo=Wo, Wo8=Wo8)
    out = pl.pallas_call(
        kernel,
        out_shape=jax.ShapeDtypeStruct((Bp, Ho, Wo, cout), jnp.bfloat16),
        grid=(Bp // NB,),
        in_specs=[
            pl.BlockSpec((NB, H, Wp // stride, stride * Cin), lambda b: (b, 0, 0, 0)),
            pl.BlockSpec(w_taps.shape, lambda b: (0, 0, 0)),
            pl.BlockSpec(bias.shape, lambda b: (0, 0)),
        ],
        out_specs=pl.BlockSpec((NB, Ho, Wo, cout), lambda b: (b, 0, 0, 0)),
        compiler_params=pltpu.CompilerParams(dimension_semantics=("parallel",)),
    )(xr, w_taps, bias)
    return out[:B]


# --------------------- fused Linear -> ReLU -> Linear head ------------------- #
def _mlp_head_kernel(x_ref, w1_ref, b1_ref, w2_ref, b2_ref, o_ref):
    h = jnp.dot(x_ref[...], w1_ref[...], preferred_element_type=jnp.float32)
    h = jnp.maximum(h + b1_ref[...], 0.0).astype(jnp.bfloat16)
    y = jnp.dot(h, w2_ref[...], preferred_element_type=jnp.float32) + b2_ref[...]
    o_ref[...] = y.astype(o_ref.dtype)


def mlp_head(xf, w1, b1, w2, b2):
    """y = relu(xf @ w1 + b1) @ w2 + b2, fused in one kernel, tiled over batch rows."""
    B, K = xf.shape
    N1 = w1.shape[1]
    N2 = w2.shape[1]
    TM = min(256, _round_up(B, 8))              # v6e/v7x MXU is 256 rows wide
    if B >= 16 and _round_up(B, TM) == TM:      # keep >= 2 grid steps for v7x's 2 TCs
        TM = _round_up(-(-B // 2), 8)
    Bp = _round_up(B, TM)
    if Bp != B:
        xf = jnp.pad(xf, ((0, Bp - B), (0, 0)))
    out = pl.pallas_call(
        _mlp_head_kernel,
        out_shape=jax.ShapeDtypeStruct((Bp, N2), jnp.float32),
        grid=(Bp // TM,),
        in_specs=[
            pl.BlockSpec((TM, K), lambda m: (m, 0)),
            pl.BlockSpec((K, N1), lambda m: (0, 0)),
            pl.BlockSpec((1, N1), lambda m: (0, 0)),
            pl.BlockSpec((N1, N2), lambda m: (0, 0)),
            pl.BlockSpec((1, N2), lambda m: (0, 0)),
        ],
        out_specs=pl.BlockSpec((TM, N2), lambda m: (m, 0)),
        compiler_params=pltpu.CompilerParams(dimension_semantics=("parallel",)),
    )(xf, w1, b1, w2, b2)
    return out[:B]


# --------------------------------- forward ----------------------------------- #
def nature_cnn_forward(p, x, output_dim):
    """x: (B, C, H, W) NCHW like the PyTorch module. Returns (B, output_dim) f32."""
    x = jnp.transpose(x, (0, 2, 3, 1)).astype(jnp.float32)     # NCHW -> NHWC once
    x = conv2d_relu(x, p["c1_w"], p["c1_b"], kh=8, kw=8, stride=4)
    x = conv2d_relu(x, p["c2_w"], p["c2_b"], kh=4, kw=4, stride=2)
    x = conv2d_relu(x, p["c3_w"], p["c3_b"], kh=3, kw=3, stride=1)
    xf = x.reshape(x.shape[0], -1)       # NHWC flatten; remapped into l1_w at init
    y = mlp_head(xf, p["l1_w"], p["l1_b"], p["l2_w"], p["l2_b"])
    return y[:, :output_dim]


# ---------------------------- parameter handling ------------------------------ #
def init_torch_params(key, input_shape, output_dim):
    """PyTorch-layout parameters (same shapes as the nn.Module)."""
    C, H, W = input_shape
    h1, w1 = _conv_out(H, 8, 4), _conv_out(W, 8, 4)
    h2, w2 = _conv_out(h1, 4, 2), _conv_out(w1, 4, 2)
    h3, w3 = _conv_out(h2, 3, 1), _conv_out(w2, 3, 1)
    n_flatten = 64 * h3 * w3
    ks = jax.random.split(key, 10)

    def u(k, shape, fan_in):
        bound = 1.0 / math.sqrt(fan_in)
        return jax.random.uniform(k, shape, jnp.float32, -bound, bound)

    params = {
        "c1_w": u(ks[0], (32, C, 8, 8), C * 8 * 8),
        "c1_b": u(ks[1], (32,), C * 8 * 8),
        "c2_w": u(ks[2], (64, 32, 4, 4), 32 * 4 * 4),
        "c2_b": u(ks[3], (64,), 32 * 4 * 4),
        "c3_w": u(ks[4], (64, 64, 3, 3), 64 * 3 * 3),
        "c3_b": u(ks[5], (64,), 64 * 3 * 3),
        "l1_w": u(ks[6], (512, n_flatten), n_flatten),
        "l1_b": u(ks[7], (512,), n_flatten),
        "l2_w": u(ks[8], (output_dim, 512), 512),
        "l2_b": u(ks[9], (output_dim,), 512),
    }
    return params, (h3, w3)


def _prep_conv(w, b, stride, cin_eff, cout_pad):
    """(O, C, kh, kw) torch conv weight -> (kh*ceil(kw/s), s*cin_eff, cout_pad) bf16 taps."""
    O, C, kh, kw = w.shape
    n_q = -(-kw // stride)
    kw_pad = n_q * stride
    wt = jnp.transpose(w, (2, 3, 1, 0))                                  # (kh, kw, C, O)
    wt = jnp.pad(wt, ((0, 0), (0, kw_pad - kw), (0, cin_eff - C), (0, cout_pad - O)))
    wt = wt.reshape(kh, n_q, stride, cin_eff, cout_pad)
    wt = wt.reshape(kh * n_q, stride * cin_eff, cout_pad).astype(jnp.bfloat16)
    bp = jnp.pad(b, (0, cout_pad - O)).reshape(1, cout_pad).astype(jnp.float32)
    return wt, bp


def prepare_params(tp, input_shape, output_dim, hw3):
    """One-time re-layout / bf16 cast of torch-style params into kernel layouts."""
    C, _, _ = input_shape
    h3, w3 = hw3
    cout2 = tp["c2_w"].shape[0]                      # 64
    cout3 = tp["c3_w"].shape[0]                      # 64 (no padding -> no zero columns in l1)
    c1w, c1b = _prep_conv(tp["c1_w"], tp["c1_b"], 4, C, C1_OUT_PAD)
    c2w, c2b = _prep_conv(tp["c2_w"], tp["c2_b"], 2, C1_OUT_PAD, cout2)
    c3w, c3b = _prep_conv(tp["c3_w"], tp["c3_b"], 1, cout2, cout3)

    # l1: remap columns from PyTorch NCHW flatten order to NHWC flatten order.
    w1 = tp["l1_w"].reshape(512, cout3, h3, w3)
    w1 = jnp.transpose(w1, (2, 3, 1, 0)).reshape(h3 * w3 * cout3, 512).astype(jnp.bfloat16)
    b1 = tp["l1_b"].reshape(1, 512).astype(jnp.float32)

    nout_pad = _round_up(output_dim, LANE)
    w2 = jnp.pad(jnp.transpose(tp["l2_w"]), ((0, 0), (0, nout_pad - output_dim)))
    w2 = w2.astype(jnp.bfloat16)
    b2 = jnp.pad(tp["l2_b"], (0, nout_pad - output_dim)).reshape(1, nout_pad)
    b2 = b2.astype(jnp.float32)

    return {"c1_w": c1w, "c1_b": c1b, "c2_w": c2w, "c2_b": c2b,
            "c3_w": c3w, "c3_b": c3b, "l1_w": w1, "l1_b": b1,
            "l2_w": w2, "l2_b": b2}


# ----------------------------- pure-JAX reference ------------------------------ #
def reference_forward(tp, x):
    prec = jax.lax.Precision.HIGHEST

    def conv(v, w, b, s):
        y = jax.lax.conv_general_dilated(
            v, w, (s, s), "VALID",
            dimension_numbers=("NCHW", "OIHW", "NCHW"), precision=prec)
        return jnp.maximum(y + b[None, :, None, None], 0.0)

    y = conv(x, tp["c1_w"], tp["c1_b"], 4)
    y = conv(y, tp["c2_w"], tp["c2_b"], 2)
    y = conv(y, tp["c3_w"], tp["c3_b"], 1)
    y = y.reshape(y.shape[0], -1)
    y = jnp.maximum(jnp.dot(y, tp["l1_w"].T, precision=prec) + tp["l1_b"], 0.0)
    return jnp.dot(y, tp["l2_w"].T, precision=prec) + tp["l2_b"]


# ----------------------------------- main -------------------------------------- #
if __name__ == "__main__":
    key = jax.random.PRNGKey(0)
    input_shape = (4, 36, 36)     # (C, H, W): smallest spatial size valid for all convs
    output_dim = 16
    batch = 2

    pkey, xkey = jax.random.split(key)
    torch_params, hw3 = init_torch_params(pkey, input_shape, output_dim)
    params = prepare_params(torch_params, input_shape, output_dim, hw3)

    x = jax.random.uniform(xkey, (batch,) + input_shape, jnp.float32)

    fwd = jax.jit(functools.partial(nature_cnn_forward, output_dim=output_dim))
    out = jax.block_until_ready(fwd(params, x))

    assert out.shape == (batch, output_dim), out.shape
    assert out.dtype == jnp.float32

    ref = reference_forward(torch_params, x)
    err = float(jnp.max(jnp.abs(out - ref)))
    tol = 2e-2 * (float(jnp.max(jnp.abs(ref))) + 1.0)
    assert err <= tol, f"max abs err {err} vs tol {tol}"

    print("KERNEL_OK")
</pallas_src>

<mosaic_0001>
module attributes {stable_mosaic.version = 11 : i64} {
  func.func @_conv_relu_kernel(%arg0: i32, %arg1: memref<1x36x9x16xf32, #tpu.memory_space<vmem>>, %arg2: memref<16x16x64xbf16, #tpu.memory_space<vmem>>, %arg3: memref<1x64xf32, #tpu.memory_space<vmem>>, %arg4: memref<1x8x8x64xbf16, #tpu.memory_space<vmem>>) attributes {dimension_semantics = [#tpu.dimension_semantics<parallel>], iteration_bounds = array<i64: 2>, scalar_prefetch = 0 : i64, scratch_operands = 0 : i64, tpu.core_type = #tpu.core_type<tc>, window_params = [{transform_indices = @transform_0, window_bounds = array<i64: 1, 36, 9, 16>}, {pipeline_mode = #tpu.pipeline_mode<synchronous>, transform_indices = @transform_1, window_bounds = array<i64: 16, 16, 64>}, {pipeline_mode = #tpu.pipeline_mode<synchronous>, transform_indices = @transform_2, window_bounds = array<i64: 1, 64>}, {transform_indices = @transform_3, window_bounds = array<i64: 1, 8, 8, 64>}]} {
    %c0 = arith.constant 0 : index
    %c0_0 = arith.constant 0 : index
    %0 = vector.load %arg3[%c0, %c0_0] : memref<1x64xf32, #tpu.memory_space<vmem>>, vector<1x64xf32>
    %c0_i32 = arith.constant 0 : i32
    %c8_i32 = arith.constant 8 : i32
    %1 = arith.addi %c0_i32, %c8_i32 : i32
    %c1_i32 = arith.constant 1 : i32
    scf.for %arg5 = %c0_i32 to %1 step %c1_i32  : i32 {
      %c4_i32 = arith.constant 4 : i32
      %2 = arith.muli %arg5, %c4_i32 : i32
      %cst = arith.constant 0.000000e+00 : f32
      %3 = vector.broadcast %cst : f32 to vector<8x64xf32>
      %c0_i32_2 = arith.constant 0 : i32
      %4 = arith.addi %2, %c0_i32_2 : i32
      %c0_3 = arith.constant 0 : index
      %5 = arith.index_cast %4 : i32 to index
      %c0_4 = arith.constant 0 : index
      %c0_5 = arith.constant 0 : index
      %6 = vector.load %arg1[%c0_3, %5, %c0_4, %c0_5] : memref<1x36x9x16xf32, #tpu.memory_space<vmem>>, vector<1x1x8x16xf32>
      %7 = vector.shape_cast %6 : vector<1x1x8x16xf32> to vector<8x16xf32>
      %8 = arith.truncf %7 : vector<8x16xf32> to vector<8x16xbf16>
      %c0_6 = arith.constant 0 : index
      %c0_7 = arith.constant 0 : index
      %c0_8 = arith.constant 0 : index
      %9 = vector.load %arg2[%c0_6, %c0_7, %c0_8] : memref<16x16x64xbf16, #tpu.memory_space<vmem>>, vector<1x16x64xbf16>
      %10 = vector.shape_cast %9 : vector<1x16x64xbf16> to vector<16x64xbf16>
      %cst_9 = arith.constant dense<0.000000e+00> : vector<8x64xf32>
      %11 = tpu.matmul %8, %10, %cst_9 {dimension_numbers = #tpu.dot_dimension_numbers<[1], [0], [0], [1], [0, 0, 1, 1], [], []>} : vector<8x16xbf16>, vector<16x64xbf16>, vector<8x64xf32> -> vector<8x64xf32>
      %12 = arith.addf %3, %11 : vector<8x64xf32>
      %c0_i32_10 = arith.constant 0 : i32
      %13 = arith.addi %2, %c0_i32_10 : i32
      %c0_11 = arith.constant 0 : index
      %14 = arith.index_cast %13 : i32 to index
      %c1 = arith.constant 1 : index
      %c0_12 = arith.constant 0 : index
      %15 = vector.load %arg1[%c0_11, %14, %c1, %c0_12] : memref<1x36x9x16xf32, #tpu.memory_space<vmem>>, vector<1x1x8x16xf32>
      %16 = vector.shape_cast %15 : vector<1x1x8x16xf32> to vector<8x16xf32>
      %17 = arith.truncf %16 : vector<8x16xf32> to vector<8x16xbf16>
      %c1_13 = arith.constant 1 : index
      %c0_14 = arith.constant 0 : index
      %c0_15 = arith.constant 0 : index
      %18 = vector.load %arg2[%c1_13, %c0_14, %c0_15] : memref<16x16x64xbf16, #tpu.memory_space<vmem>>, vector<1x16x64xbf16>
      %19 = vector.shape_cast %18 : vector<1x16x64xbf16> to vector<16x64xbf16>
      %cst_16 = arith.constant dense<0.000000e+00> : vector<8x64xf32>
      %20 = tpu.matmul %17, %19, %cst_16 {dimension_numbers = #tpu.dot_dimension_numbers<[1], [0], [0], [1], [0, 0, 1, 1], [], []>} : vector<8x16xbf16>, vector<16x64xbf16>, vector<8x64xf32> -> vector<8x64xf32>
      %21 = arith.addf %12, %20 : vector<8x64xf32>
      %c1_i32_17 = arith.constant 1 : i32
      %22 = arith.addi %2, %c1_i32_17 : i32
      %c0_18 = arith.constant 0 : index
      %23 = arith.index_cast %22 : i32 to index
      %c0_19 = arith.constant 0 : index
      %c0_20 = arith.constant 0 : index
      %24 = vector.load %arg1[%c0_18, %23, %c0_19, %c0_20] : memref<1x36x9x16xf32, #tpu.memory_space<vmem>>, vector<1x1x8x16xf32>
      %25 = vector.shape_cast %24 : vector<1x1x8x16xf32> to vector<8x16xf32>
      %26 = arith.truncf %25 : vector<8x16xf32> to vector<8x16xbf16>
      %c2 = arith.constant 2 : index
      %c0_21 = arith.constant 0 : index
      %c0_22 = arith.constant 0 : index
      %27 = vector.load %arg2[%c2, %c0_21, %c0_22] : memref<16x16x64xbf16, #tpu.memory_space<vmem>>, vector<1x16x64xbf16>
      %28 = vector.shape_cast %27 : vector<1x16x64xbf16> to vector<16x64xbf16>
      %cst_23 = arith.constant dense<0.000000e+00> : vector<8x64xf32>
      %29 = tpu.matmul %26, %28, %cst_23 {dimension_numbers = #tpu.dot_dimension_numbers<[1], [0], [0], [1], [0, 0, 1, 1], [], []>} : vector<8x16xbf16>, vector<16x64xbf16>, vector<8x64xf32> -> vector<8x64xf32>
      %30 = arith.addf %21, %29 : vector<8x64xf32>
      %c1_i32_24 = arith.constant 1 : i32
      %31 = arith.addi %2, %c1_i32_24 : i32
      %c0_25 = arith.constant 0 : index
      %32 = arith.index_cast %31 : i32 to index
      %c1_26 = arith.constant 1 : index
      %c0_27 = arith.constant 0 : index
      %33 = vector.load %arg1[%c0_25, %32, %c1_26, %c0_27] : memref<1x36x9x16xf32, #tpu.memory_space<vmem>>, vector<1x1x8x16xf32>
      %34 = vector.shape_cast %33 : vector<1x1x8x16xf32> to vector<8x16xf32>
      %35 = arith.truncf %34 : vector<8x16xf32> to vector<8x16xbf16>
      %c3 = arith.constant 3 : index
      %c0_28 = arith.constant 0 : index
      %c0_29 = arith.constant 0 : index
      %36 = vector.load %arg2[%c3, %c0_28, %c0_29] : memref<16x16x64xbf16, #tpu.memory_space<vmem>>, vector<1x16x64xbf16>
      %37 = vector.shape_cast %36 : vector<1x16x64xbf16> to vector<16x64xbf16>
      %cst_30 = arith.constant dense<0.000000e+00> : vector<8x64xf32>
      %38 = tpu.matmul %35, %37, %cst_30 {dimension_numbers = #tpu.dot_dimension_numbers<[1], [0], [0], [1], [0, 0, 1, 1], [], []>} : vector<8x16xbf16>, vector<16x64xbf16>, vector<8x64xf32> -> vector<8x64xf32>
      %39 = arith.addf %30, %38 : vector<8x64xf32>
      %c2_i32 = arith.constant 2 : i32
      %40 = arith.addi %2, %c2_i32 : i32
      %c0_31 = arith.constant 0 : index
      %41 = arith.index_cast %40 : i32 to index
      %c0_32 = arith.constant 0 : index
      %c0_33 = arith.constant 0 : index
      %42 = vector.load %arg1[%c0_31, %41, %c0_32, %c0_33] : memref<1x36x9x16xf32, #tpu.memory_space<vmem>>, vector<1x1x8x16xf32>
      %43 = vector.shape_cast %42 : vector<1x1x8x16xf32> to vector<8x16xf32>
      %44 = arith.truncf %43 : vector<8x16xf32> to vector<8x16xbf16>
      %c4 = arith.constant 4 : index
      %c0_34 = arith.constant 0 : index
      %c0_35 = arith.constant 0 : index
      %45 = vector.load %arg2[%c4, %c0_34, %c0_35] : memref<16x16x64xbf16, #tpu.memory_space<vmem>>, vector<1x16x64xbf16>
      %46 = vector.shape_cast %45 : vector<1x16x64xbf16> to vector<16x64xbf16>
      %cst_36 = arith.constant dense<0.000000e+00> : vector<8x64xf32>
      %47 = tpu.matmul %44, %46, %cst_36 {dimension_numbers = #tpu.dot_dimension_numbers<[1], [0], [0], [1], [0, 0, 1, 1], [], []>} : vector<8x16xbf16>, vector<16x64xbf16>, vector<8x64xf32> -> vector<8x64xf32>
      %48 = arith.addf %39, %47 : vector<8x64xf32>
      %c2_i32_37 = arith.constant 2 : i32
      %49 = arith.addi %2, %c2_i32_37 : i32
      %c0_38 = arith.constant 0 : index
      %50 = arith.index_cast %49 : i32 to index
      %c1_39 = arith.constant 1 : index
      %c0_40 = arith.constant 0 : index
      %51 = vector.load %arg1[%c0_38, %50, %c1_39, %c0_40] : memref<1x36x9x16xf32, #tpu.memory_space<vmem>>, vector<1x1x8x16xf32>
      %52 = vector.shape_cast %51 : vector<1x1x8x16xf32> to vector<8x16xf32>
      %53 = arith.truncf %52 : vector<8x16xf32> to vector<8x16xbf16>
      %c5 = arith.constant 5 : index
      %c0_41 = arith.constant 0 : index
      %c0_42 = arith.constant 0 : index
      %54 = vector.load %arg2[%c5, %c0_41, %c0_42] : memref<16x16x64xbf16, #tpu.memory_space<vmem>>, vector<1x16x64xbf16>
      %55 = vector.shape_cast %54 : vector<1x16x64xbf16> to vector<16x64xbf16>
      %cst_43 = arith.constant dense<0.000000e+00> : vector<8x64xf32>
      %56 = tpu.matmul %53, %55, %cst_43 {dimension_numbers = #tpu.dot_dimension_numbers<[1], [0], [0], [1], [0, 0, 1, 1], [], []>} : vector<8x16xbf16>, vector<16x64xbf16>, vector<8x64xf32> -> vector<8x64xf32>
      %57 = arith.addf %48, %56 : vector<8x64xf32>
      %c3_i32 = arith.constant 3 : i32
      %58 = arith.addi %2, %c3_i32 : i32
      %c0_44 = arith.constant 0 : index
      %59 = arith.index_cast %58 : i32 to index
      %c0_45 = arith.constant 0 : index
      %c0_46 = arith.constant 0 : index
      %60 = vector.load %arg1[%c0_44, %59, %c0_45, %c0_46] : memref<1x36x9x16xf32, #tpu.memory_space<vmem>>, vector<1x1x8x16xf32>
      %61 = vector.shape_cast %60 : vector<1x1x8x16xf32> to vector<8x16xf32>
      %62 = arith.truncf %61 : vector<8x16xf32> to vector<8x16xbf16>
      %c6 = arith.constant 6 : index
      %c0_47 = arith.constant 0 : index
      %c0_48 = arith.constant 0 : index
      %63 = vector.load %arg2[%c6, %c0_47, %c0_48] : memref<16x16x64xbf16, #tpu.memory_space<vmem>>, vector<1x16x64xbf16>
      %64 = vector.shape_cast %63 : vector<1x16x64xbf16> to vector<16x64xbf16>
      %cst_49 = arith.constant dense<0.000000e+00> : vector<8x64xf32>
      %65 = tpu.matmul %62, %64, %cst_49 {dimension_numbers = #tpu.dot_dimension_numbers<[1], [0], [0], [1], [0, 0, 1, 1], [], []>} : vector<8x16xbf16>, vector<16x64xbf16>, vector<8x64xf32> -> vector<8x64xf32>
      %66 = arith.addf %57, %65 : vector<8x64xf32>
      %c3_i32_50 = arith.constant 3 : i32
      %67 = arith.addi %2, %c3_i32_50 : i32
      %c0_51 = arith.constant 0 : index
      %68 = arith.index_cast %67 : i32 to index
      %c1_52 = arith.constant 1 : index
      %c0_53 = arith.constant 0 : index
      %69 = vector.load %arg1[%c0_51, %68, %c1_52, %c0_53] : memref<1x36x9x16xf32, #tpu.memory_space<vmem>>, vector<1x1x8x16xf32>
      %70 = vector.shape_cast %69 : vector<1x1x8x16xf32> to vector<8x16xf32>
      %71 = arith.truncf %70 : vector<8x16xf32> to vector<8x16xbf16>
      %c7 = arith.constant 7 : index
      %c0_54 = arith.constant 0 : index
      %c0_55 = arith.constant 0 : index
      %72 = vector.load %arg2[%c7, %c0_54, %c0_55] : memref<16x16x64xbf16, #tpu.memory_space<vmem>>, vector<1x16x64xbf16>
      %73 = vector.shape_cast %72 : vector<1x16x64xbf16> to vector<16x64xbf16>
      %cst_56 = arith.constant dense<0.000000e+00> : vector<8x64xf32>
      %74 = tpu.matmul %71, %73, %cst_56 {dimension_numbers = #tpu.dot_dimension_numbers<[1], [0], [0], [1], [0, 0, 1, 1], [], []>} : vector<8x16xbf16>, vector<16x64xbf16>, vector<8x64xf32> -> vector<8x64xf32>
      %75 = arith.addf %66, %74 : vector<8x64xf32>
      %c4_i32_57 = arith.constant 4 : i32
      %76 = arith.addi %2, %c4_i32_57 : i32
      %c0_58 = arith.constant 0 : index
      %77 = arith.index_cast %76 : i32 to index
      %c0_59 = arith.constant 0 : index
      %c0_60 = arith.constant 0 : index
      %78 = vector.load %arg1[%c0_58, %77, %c0_59, %c0_60] : memref<1x36x9x16xf32, #tpu.memory_space<vmem>>, vector<1x1x8x16xf32>
      %79 = vector.shape_cast %78 : vector<1x1x8x16xf32> to vector<8x16xf32>
      %80 = arith.truncf %79 : vector<8x16xf32> to vector<8x16xbf16>
      %c8 = arith.constant 8 : index
      %c0_61 = arith.constant 0 : index
      %c0_62 = arith.constant 0 : index
      %81 = vector.load %arg2[%c8, %c0_61, %c0_62] : memref<16x16x64xbf16, #tpu.memory_space<vmem>>, vector<1x16x64xbf16>
      %82 = vector.shape_cast %81 : vector<1x16x64xbf16> to vector<16x64xbf16>
      %cst_63 = arith.constant dense<0.000000e+00> : vector<8x64xf32>
      %83 = tpu.matmul %80, %82, %cst_63 {dimension_numbers = #tpu.dot_dimension_numbers<[1], [0], [0], [1], [0, 0, 1, 1], [], []>} : vector<8x16xbf16>, vector<16x64xbf16>, vector<8x64xf32> -> vector<8x64xf32>
      %84 = arith.addf %75, %83 : vector<8x64xf32>
      %c4_i32_64 = arith.constant 4 : i32
      %85 = arith.addi %2, %c4_i32_64 : i32
      %c0_65 = arith.constant 0 : index
      %86 = arith.index_cast %85 : i32 to index
      %c1_66 = arith.constant 1 : index
      %c0_67 = arith.constant 0 : index
      %87 = vector.load %arg1[%c0_65, %86, %c1_66, %c0_67] : memref<1x36x9x16xf32, #tpu.memory_space<vmem>>, vector<1x1x8x16xf32>
      %88 = vector.shape_cast %87 : vector<1x1x8x16xf32> to vector<8x16xf32>
      %89 = arith.truncf %88 : vector<8x16xf32> to vector<8x16xbf16>
      %c9 = arith.constant 9 : index
      %c0_68 = arith.constant 0 : index
      %c0_69 = arith.constant 0 : index
      %90 = vector.load %arg2[%c9, %c0_68, %c0_69] : memref<16x16x64xbf16, #tpu.memory_space<vmem>>, vector<1x16x64xbf16>
      %91 = vector.shape_cast %90 : vector<1x16x64xbf16> to vector<16x64xbf16>
      %cst_70 = arith.constant dense<0.000000e+00> : vector<8x64xf32>
      %92 = tpu.matmul %89, %91, %cst_70 {dimension_numbers = #tpu.dot_dimension_numbers<[1], [0], [0], [1], [0, 0, 1, 1], [], []>} : vector<8x16xbf16>, vector<16x64xbf16>, vector<8x64xf32> -> vector<8x64xf32>
      %93 = arith.addf %84, %92 : vector<8x64xf32>
      %c5_i32 = arith.constant 5 : i32
      %94 = arith.addi %2, %c5_i32 : i32
      %c0_71 = arith.constant 0 : index
      %95 = arith.index_cast %94 : i32 to index
      %c0_72 = arith.constant 0 : index
      %c0_73 = arith.constant 0 : index
      %96 = vector.load %arg1[%c0_71, %95, %c0_72, %c0_73] : memref<1x36x9x16xf32, #tpu.memory_space<vmem>>, vector<1x1x8x16xf32>
      %97 = vector.shape_cast %96 : vector<1x1x8x16xf32> to vector<8x16xf32>
      %98 = arith.truncf %97 : vector<8x16xf32> to vector<8x16xbf16>
      %c10 = arith.constant 10 : index
      %c0_74 = arith.constant 0 : index
      %c0_75 = arith.constant 0 : index
      %99 = vector.load %arg2[%c10, %c0_74, %c0_75] : memref<16x16x64xbf16, #tpu.memory_space<vmem>>, vector<1x16x64xbf16>
      %100 = vector.shape_cast %99 : vector<1x16x64xbf16> to vector<16x64xbf16>
      %cst_76 = arith.constant dense<0.000000e+00> : vector<8x64xf32>
      %101 = tpu.matmul %98, %100, %cst_76 {dimension_numbers = #tpu.dot_dimension_numbers<[1], [0], [0], [1], [0, 0, 1, 1], [], []>} : vector<8x16xbf16>, vector<16x64xbf16>, vector<8x64xf32> -> vector<8x64xf32>
      %102 = arith.addf %93, %101 : vector<8x64xf32>
      %c5_i32_77 = arith.constant 5 : i32
      %103 = arith.addi %2, %c5_i32_77 : i32
      %c0_78 = arith.constant 0 : index
      %104 = arith.index_cast %103 : i32 to index
      %c1_79 = arith.constant 1 : index
      %c0_80 = arith.constant 0 : index
      %105 = vector.load %arg1[%c0_78, %104, %c1_79, %c0_80] : memref<1x36x9x16xf32, #tpu.memory_space<vmem>>, vector<1x1x8x16xf32>
      %106 = vector.shape_cast %105 : vector<1x1x8x16xf32> to vector<8x16xf32>
      %107 = arith.truncf %106 : vector<8x16xf32> to vector<8x16xbf16>
      %c11 = arith.constant 11 : index
      %c0_81 = arith.constant 0 : index
      %c0_82 = arith.constant 0 : index
      %108 = vector.load %arg2[%c11, %c0_81, %c0_82] : memref<16x16x64xbf16, #tpu.memory_space<vmem>>, vector<1x16x64xbf16>
      %109 = vector.shape_cast %108 : vector<1x16x64xbf16> to vector<16x64xbf16>
      %cst_83 = arith.constant dense<0.000000e+00> : vector<8x64xf32>
      %110 = tpu.matmul %107, %109, %cst_83 {dimension_numbers = #tpu.dot_dimension_numbers<[1], [0], [0], [1], [0, 0, 1, 1], [], []>} : vector<8x16xbf16>, vector<16x64xbf16>, vector<8x64xf32> -> vector<8x64xf32>
      %111 = arith.addf %102, %110 : vector<8x64xf32>
      %c6_i32 = arith.constant 6 : i32
      %112 = arith.addi %2, %c6_i32 : i32
      %c0_84 = arith.constant 0 : index
      %113 = arith.index_cast %112 : i32 to index
      %c0_85 = arith.constant 0 : index
      %c0_86 = arith.constant 0 : index
      %114 = vector.load %arg1[%c0_84, %113, %c0_85, %c0_86] : memref<1x36x9x16xf32, #tpu.memory_space<vmem>>, vector<1x1x8x16xf32>
      %115 = vector.shape_cast %114 : vector<1x1x8x16xf32> to vector<8x16xf32>
      %116 = arith.truncf %115 : vector<8x16xf32> to vector<8x16xbf16>
      %c12 = arith.constant 12 : index
      %c0_87 = arith.constant 0 : index
      %c0_88 = arith.constant 0 : index
      %117 = vector.load %arg2[%c12, %c0_87, %c0_88] : memref<16x16x64xbf16, #tpu.memory_space<vmem>>, vector<1x16x64xbf16>
      %118 = vector.shape_cast %117 : vector<1x16x64xbf16> to vector<16x64xbf16>
      %cst_89 = arith.constant dense<0.000000e+00> : vector<8x64xf32>
      %119 = tpu.matmul %116, %118, %cst_89 {dimension_numbers = #tpu.dot_dimension_numbers<[1], [0], [0], [1], [0, 0, 1, 1], [], []>} : vector<8x16xbf16>, vector<16x64xbf16>, vector<8x64xf32> -> vector<8x64xf32>
      %120 = arith.addf %111, %119 : vector<8x64xf32>
      %c6_i32_90 = arith.constant 6 : i32
      %121 = arith.addi %2, %c6_i32_90 : i32
      %c0_91 = arith.constant 0 : index
      %122 = arith.index_cast %121 : i32 to index
      %c1_92 = arith.constant 1 : index
      %c0_93 = arith.constant 0 : index
      %123 = vector.load %arg1[%c0_91, %122, %c1_92, %c0_93] : memref<1x36x9x16xf32, #tpu.memory_space<vmem>>, vector<1x1x8x16xf32>
      %124 = vector.shape_cast %123 : vector<1x1x8x16xf32> to vector<8x16xf32>
      %125 = arith.truncf %124 : vector<8x16xf32> to vector<8x16xbf16>
      %c13 = arith.constant 13 : index
      %c0_94 = arith.constant 0 : index
      %c0_95 = arith.constant 0 : index
      %126 = vector.load %arg2[%c13, %c0_94, %c0_95] : memref<16x16x64xbf16, #tpu.memory_space<vmem>>, vector<1x16x64xbf16>
      %127 = vector.shape_cast %126 : vector<1x16x64xbf16> to vector<16x64xbf16>
      %cst_96 = arith.constant dense<0.000000e+00> : vector<8x64xf32>
      %128 = tpu.matmul %125, %127, %cst_96 {dimension_numbers = #tpu.dot_dimension_numbers<[1], [0], [0], [1], [0, 0, 1, 1], [], []>} : vector<8x16xbf16>, vector<16x64xbf16>, vector<8x64xf32> -> vector<8x64xf32>
      %129 = arith.addf %120, %128 : vector<8x64xf32>
      %c7_i32 = arith.constant 7 : i32
      %130 = arith.addi %2, %c7_i32 : i32
      %c0_97 = arith.constant 0 : index
      %131 = arith.index_cast %130 : i32 to index
      %c0_98 = arith.constant 0 : index
      %c0_99 = arith.constant 0 : index
      %132 = vector.load %arg1[%c0_97, %131, %c0_98, %c0_99] : memref<1x36x9x16xf32, #tpu.memory_space<vmem>>, vector<1x1x8x16xf32>
      %133 = vector.shape_cast %132 : vector<1x1x8x16xf32> to vector<8x16xf32>
      %134 = arith.truncf %133 : vector<8x16xf32> to vector<8x16xbf16>
      %c14 = arith.constant 14 : index
      %c0_100 = arith.constant 0 : index
      %c0_101 = arith.constant 0 : index
      %135 = vector.load %arg2[%c14, %c0_100, %c0_101] : memref<16x16x64xbf16, #tpu.memory_space<vmem>>, vector<1x16x64xbf16>
      %136 = vector.shape_cast %135 : vector<1x16x64xbf16> to vector<16x64xbf16>
      %cst_102 = arith.constant dense<0.000000e+00> : vector<8x64xf32>
      %137 = tpu.matmul %134, %136, %cst_102 {dimension_numbers = #tpu.dot_dimension_numbers<[1], [0], [0], [1], [0, 0, 1, 1], [], []>} : vector<8x16xbf16>, vector<16x64xbf16>, vector<8x64xf32> -> vector<8x64xf32>
      %138 = arith.addf %129, %137 : vector<8x64xf32>
      %c7_i32_103 = arith.constant 7 : i32
      %139 = arith.addi %2, %c7_i32_103 : i32
      %c0_104 = arith.constant 0 : index
      %140 = arith.index_cast %139 : i32 to index
      %c1_105 = arith.constant 1 : index
      %c0_106 = arith.constant 0 : index
      %141 = vector.load %arg1[%c0_104, %140, %c1_105, %c0_106] : memref<1x36x9x16xf32, #tpu.memory_space<vmem>>, vector<1x1x8x16xf32>
      %142 = vector.shape_cast %141 : vector<1x1x8x16xf32> to vector<8x16xf32>
      %143 = arith.truncf %142 : vector<8x16xf32> to vector<8x16xbf16>
      %c15 = arith.constant 15 : index
      %c0_107 = arith.constant 0 : index
      %c0_108 = arith.constant 0 : index
      %144 = vector.load %arg2[%c15, %c0_107, %c0_108] : memref<16x16x64xbf16, #tpu.memory_space<vmem>>, vector<1x16x64xbf16>
      %145 = vector.shape_cast %144 : vector<1x16x64xbf16> to vector<16x64xbf16>
      %cst_109 = arith.constant dense<0.000000e+00> : vector<8x64xf32>
      %146 = tpu.matmul %143, %145, %cst_109 {dimension_numbers = #tpu.dot_dimension_numbers<[1], [0], [0], [1], [0, 0, 1, 1], [], []>} : vector<8x16xbf16>, vector<16x64xbf16>, vector<8x64xf32> -> vector<8x64xf32>
      %147 = arith.addf %138, %146 : vector<8x64xf32>
      %148 = vector.broadcast %0 : vector<1x64xf32> to vector<8x64xf32>
      %149 = arith.addf %147, %148 : vector<8x64xf32>
      %cst_110 = arith.constant 0.000000e+00 : f32
      %150 = vector.broadcast %cst_110 : f32 to vector<8x64xf32>
      %151 = arith.maximumf %149, %150 : vector<8x64xf32>
      %152 = vector.shape_cast %151 : vector<8x64xf32> to vector<1x8x64xf32>
      %153 = vector.shape_cast %152 : vector<1x8x64xf32> to vector<1x1x8x64xf32>
      %154 = arith.truncf %153 : vector<1x1x8x64xf32> to vector<1x1x8x64xbf16>
      %c0_111 = arith.constant 0 : index
      %155 = arith.index_cast %arg5 : i32 to index
      %c0_112 = arith.constant 0 : index
      %c0_113 = arith.constant 0 : index
      %156 = vector.load %arg4[%c0_111, %155, %c0_112, %c0_113] : memref<1x8x8x64xbf16, #tpu.memory_space<vmem>>, vector<1x1x8x64xbf16>
      tpu.vector_store %arg4[%c0_111, %155, %c0_112, %c0_113], %154 {strides = array<i32>} : memref<1x8x8x64xbf16, #tpu.memory_space<vmem>>, vector<1x1x8x64xbf16>,
    }
    %c8_i32_1 = arith.constant 8 : i32
    return
  }
  func.func @transform_0(%arg0: i32) -> (i32, i32, i32, i32) {
    %c0_i32 = arith.constant 0 : i32
    %c0_i32_0 = arith.constant 0 : i32
    %c0_i32_1 = arith.constant 0 : i32
    %c0_i32_2 = arith.constant 0 : i32
    return %arg0, %c0_i32, %c0_i32_0, %c0_i32_1 : i32, i32, i32, i32
  }
  func.func @transform_1(%arg0: i32) -> (i32, i32, i32) {
    %c0_i32 = arith.constant 0 : i32
    %c0_i32_0 = arith.constant 0 : i32
    %c0_i32_1 = arith.constant 0 : i32
    %c0_i32_2 = arith.constant 0 : i32
    return %c0_i32, %c0_i32_0, %c0_i32_1 : i32, i32, i32
  }
  func.func @transform_2(%arg0: i32) -> (i32, i32) {
    %c0_i32 = arith.constant 0 : i32
    %c0_i32_0 = arith.constant 0 : i32
    %c0_i32_1 = arith.constant 0 : i32
    return %c0_i32, %c0_i32_0 : i32, i32
  }
  func.func @transform_3(%arg0: i32) -> (i32, i32, i32, i32) {
    %c0_i32 = arith.constant 0 : i32
    %c0_i32_0 = arith.constant 0 : i32
    %c0_i32_1 = arith.constant 0 : i32
    %c0_i32_2 = arith.constant 0 : i32
    return %arg0, %c0_i32, %c0_i32_0, %c0_i32_1 : i32, i32, i32, i32
  }
}

module attributes {stable_mosaic.version = 11 : i64} {
  func.func @_conv_relu_kernel(%arg0: i32, %arg1: memref<1x8x9x128xbf16, #tpu.memory_space<vmem>>, %arg2: memref<8x128x64xbf16, #tpu.memory_space<vmem>>, %arg3: memref<1x64xf32, #tpu.memory_space<vmem>>, %arg4: memref<1x3x3x64xbf16, #tpu.memory_space<vmem>>) attributes {dimension_semantics = [#tpu.dimension_semantics<parallel>], iteration_bounds = array<i64: 2>, scalar_prefetch = 0 : i64, scratch_operands = 0 : i64, tpu.core_type = #tpu.core_type<tc>, window_params = [{transform_indices = @transform_0, window_bounds = array<i64: 1, 8, 9, 128>}, {pipeline_mode = #tpu.pipeline_mode<synchronous>, transform_indices = @transform_1, window_bounds = array<i64: 8, 128, 64>}, {pipeline_mode = #tpu.pipeline_mode<synchronous>, transform_indices = @transform_2, window_bounds = array<i64: 1, 64>}, {transform_indices = @transform_3, window_bounds = array<i64: 1, 3, 3, 64>}]} {
    %c0 = arith.constant 0 : index
    %c0_0 = arith.constant 0 : index
    %0 = vector.load %arg3[%c0, %c0_0] : memref<1x64xf32, #tpu.memory_space<vmem>>, vector<1x64xf32>
    %c0_i32 = arith.constant 0 : i32
    %c3_i32 = arith.constant 3 : i32
    %1 = arith.addi %c0_i32, %c3_i32 : i32
    %c1_i32 = arith.constant 1 : i32
    scf.for %arg5 = %c0_i32 to %1 step %c1_i32  : i32 {
      %c2_i32 = arith.constant 2 : i32
      %2 = arith.muli %arg5, %c2_i32 : i32
      %cst = arith.constant 0.000000e+00 : f32
      %3 = vector.broadcast %cst : f32 to vector<8x64xf32>
      %c0_i32_2 = arith.constant 0 : i32
      %4 = arith.addi %2, %c0_i32_2 : i32
      %c0_3 = arith.constant 0 : index
      %5 = arith.index_cast %4 : i32 to index
      %c0_4 = arith.constant 0 : index
      %c0_5 = arith.constant 0 : index
      %6 = vector.load %arg1[%c0_3, %5, %c0_4, %c0_5] : memref<1x8x9x128xbf16, #tpu.memory_space<vmem>>, vector<1x1x8x128xbf16>
      %7 = vector.shape_cast %6 : vector<1x1x8x128xbf16> to vector<8x128xbf16>
      %c0_6 = arith.constant 0 : index
      %c0_7 = arith.constant 0 : index
      %c0_8 = arith.constant 0 : index
      %8 = vector.load %arg2[%c0_6, %c0_7, %c0_8] : memref<8x128x64xbf16, #tpu.memory_space<vmem>>, vector<1x128x64xbf16>
      %9 = vector.shape_cast %8 : vector<1x128x64xbf16> to vector<128x64xbf16>
      %cst_9 = arith.constant dense<0.000000e+00> : vector<8x64xf32>
      %10 = tpu.matmul %7, %9, %cst_9 {dimension_numbers = #tpu.dot_dimension_numbers<[1], [0], [0], [1], [0, 0, 1, 1], [], []>} : vector<8x128xbf16>, vector<128x64xbf16>, vector<8x64xf32> -> vector<8x64xf32>
      %11 = arith.addf %3, %10 : vector<8x64xf32>
      %c0_i32_10 = arith.constant 0 : i32
      %12 = arith.addi %2, %c0_i32_10 : i32
      %c0_11 = arith.constant 0 : index
      %13 = arith.index_cast %12 : i32 to index
      %c1 = arith.constant 1 : index
      %c0_12 = arith.constant 0 : index
      %14 = vector.load %arg1[%c0_11, %13, %c1, %c0_12] : memref<1x8x9x128xbf16, #tpu.memory_space<vmem>>, vector<1x1x8x128xbf16>
      %15 = vector.shape_cast %14 : vector<1x1x8x128xbf16> to vector<8x128xbf16>
      %c1_13 = arith.constant 1 : index
      %c0_14 = arith.constant 0 : index
      %c0_15 = arith.constant 0 : index
      %16 = vector.load %arg2[%c1_13, %c0_14, %c0_15] : memref<8x128x64xbf16, #tpu.memory_space<vmem>>, vector<1x128x64xbf16>
      %17 = vector.shape_cast %16 : vector<1x128x64xbf16> to vector<128x64xbf16>
      %cst_16 = arith.constant dense<0.000000e+00> : vector<8x64xf32>
      %18 = tpu.matmul %15, %17, %cst_16 {dimension_numbers = #tpu.dot_dimension_numbers<[1], [0], [0], [1], [0, 0, 1, 1], [], []>} : vector<8x128xbf16>, vector<128x64xbf16>, vector<8x64xf32> -> vector<8x64xf32>
      %19 = arith.addf %11, %18 : vector<8x64xf32>
      %c1_i32_17 = arith.constant 1 : i32
      %20 = arith.addi %2, %c1_i32_17 : i32
      %c0_18 = arith.constant 0 : index
      %21 = arith.index_cast %20 : i32 to index
      %c0_19 = arith.constant 0 : index
      %c0_20 = arith.constant 0 : index
      %22 = vector.load %arg1[%c0_18, %21, %c0_19, %c0_20] : memref<1x8x9x128xbf16, #tpu.memory_space<vmem>>, vector<1x1x8x128xbf16>
      %23 = vector.shape_cast %22 : vector<1x1x8x128xbf16> to vector<8x128xbf16>
      %c2 = arith.constant 2 : index
      %c0_21 = arith.constant 0 : index
      %c0_22 = arith.constant 0 : index
      %24 = vector.load %arg2[%c2, %c0_21, %c0_22] : memref<8x128x64xbf16, #tpu.memory_space<vmem>>, vector<1x128x64xbf16>
      %25 = vector.shape_cast %24 : vector<1x128x64xbf16> to vector<128x64xbf16>
      %cst_23 = arith.constant dense<0.000000e+00> : vector<8x64xf32>
      %26 = tpu.matmul %23, %25, %cst_23 {dimension_numbers = #tpu.dot_dimension_numbers<[1], [0], [0], [1], [0, 0, 1, 1], [], []>} : vector<8x128xbf16>, vector<128x64xbf16>, vector<8x64xf32> -> vector<8x64xf32>
      %27 = arith.addf %19, %26 : vector<8x64xf32>
      %c1_i32_24 = arith.constant 1 : i32
      %28 = arith.addi %2, %c1_i32_24 : i32
      %c0_25 = arith.constant 0 : index
      %29 = arith.index_cast %28 : i32 to index
      %c1_26 = arith.constant 1 : index
      %c0_27 = arith.constant 0 : index
      %30 = vector.load %arg1[%c0_25, %29, %c1_26, %c0_27] : memref<1x8x9x128xbf16, #tpu.memory_space<vmem>>, vector<1x1x8x128xbf16>
      %31 = vector.shape_cast %30 : vector<1x1x8x128xbf16> to vector<8x128xbf16>
      %c3 = arith.constant 3 : index
      %c0_28 = arith.constant 0 : index
      %c0_29 = arith.constant 0 : index
      %32 = vector.load %arg2[%c3, %c0_28, %c0_29] : memref<8x128x64xbf16, #tpu.memory_space<vmem>>, vector<1x128x64xbf16>
      %33 = vector.shape_cast %32 : vector<1x128x64xbf16> to vector<128x64xbf16>
      %cst_30 = arith.constant dense<0.000000e+00> : vector<8x64xf32>
      %34 = tpu.matmul %31, %33, %cst_30 {dimension_numbers = #tpu.dot_dimension_numbers<[1], [0], [0], [1], [0, 0, 1, 1], [], []>} : vector<8x128xbf16>, vector<128x64xbf16>, vector<8x64xf32> -> vector<8x64xf32>
      %35 = arith.addf %27, %34 : vector<8x64xf32>
      %c2_i32_31 = arith.constant 2 : i32
      %36 = arith.addi %2, %c2_i32_31 : i32
      %c0_32 = arith.constant 0 : index
      %37 = arith.index_cast %36 : i32 to index
      %c0_33 = arith.constant 0 : index
      %c0_34 = arith.constant 0 : index
      %38 = vector.load %arg1[%c0_32, %37, %c0_33, %c0_34] : memref<1x8x9x128xbf16, #tpu.memory_space<vmem>>, vector<1x1x8x128xbf16>
      %39 = vector.shape_cast %38 : vector<1x1x8x128xbf16> to vector<8x128xbf16>
      %c4 = arith.constant 4 : index
      %c0_35 = arith.constant 0 : index
      %c0_36 = arith.constant 0 : index
      %40 = vector.load %arg2[%c4, %c0_35, %c0_36] : memref<8x128x64xbf16, #tpu.memory_space<vmem>>, vector<1x128x64xbf16>
      %41 = vector.shape_cast %40 : vector<1x128x64xbf16> to vector<128x64xbf16>
      %cst_37 = arith.constant dense<0.000000e+00> : vector<8x64xf32>
      %42 = tpu.matmul %39, %41, %cst_37 {dimension_numbers = #tpu.dot_dimension_numbers<[1], [0], [0], [1], [0, 0, 1, 1], [], []>} : vector<8x128xbf16>, vector<128x64xbf16>, vector<8x64xf32> -> vector<8x64xf32>
      %43 = arith.addf %35, %42 : vector<8x64xf32>
      %c2_i32_38 = arith.constant 2 : i32
      %44 = arith.addi %2, %c2_i32_38 : i32
      %c0_39 = arith.constant 0 : index
      %45 = arith.index_cast %44 : i32 to index
      %c1_40 = arith.constant 1 : index
      %c0_41 = arith.constant 0 : index
      %46 = vector.load %arg1[%c0_39, %45, %c1_40, %c0_41] : memref<1x8x9x128xbf16, #tpu.memory_space<vmem>>, vector<1x1x8x128xbf16>
      %47 = vector.shape_cast %46 : vector<1x1x8x128xbf16> to vector<8x128xbf16>
      %c5 = arith.constant 5 : index
      %c0_42 = arith.constant 0 : index
      %c0_43 = arith.constant 0 : index
      %48 = vector.load %arg2[%c5, %c0_42, %c0_43] : memref<8x128x64xbf16, #tpu.memory_space<vmem>>, vector<1x128x64xbf16>
      %49 = vector.shape_cast %48 : vector<1x128x64xbf16> to vector<128x64xbf16>
      %cst_44 = arith.constant dense<0.000000e+00> : vector<8x64xf32>
      %50 = tpu.matmul %47, %49, %cst_44 {dimension_numbers = #tpu.dot_dimension_numbers<[1], [0], [0], [1], [0, 0, 1, 1], [], []>} : vector<8x128xbf16>, vector<128x64xbf16>, vector<8x64xf32> -> vector<8x64xf32>
      %51 = arith.addf %43, %50 : vector<8x64xf32>
      %c3_i32_45 = arith.constant 3 : i32
      %52 = arith.addi %2, %c3_i32_45 : i32
      %c0_46 = arith.constant 0 : index
      %53 = arith.index_cast %52 : i32 to index
      %c0_47 = arith.constant 0 : index
      %c0_48 = arith.constant 0 : index
      %54 = vector.load %arg1[%c0_46, %53, %c0_47, %c0_48] : memref<1x8x9x128xbf16, #tpu.memory_space<vmem>>, vector<1x1x8x128xbf16>
      %55 = vector.shape_cast %54 : vector<1x1x8x128xbf16> to vector<8x128xbf16>
      %c6 = arith.constant 6 : index
      %c0_49 = arith.constant 0 : index
      %c0_50 = arith.constant 0 : index
      %56 = vector.load %arg2[%c6, %c0_49, %c0_50] : memref<8x128x64xbf16, #tpu.memory_space<vmem>>, vector<1x128x64xbf16>
      %57 = vector.shape_cast %56 : vector<1x128x64xbf16> to vector<128x64xbf16>
      %cst_51 = arith.constant dense<0.000000e+00> : vector<8x64xf32>
      %58 = tpu.matmul %55, %57, %cst_51 {dimension_numbers = #tpu.dot_dimension_numbers<[1], [0], [0], [1], [0, 0, 1, 1], [], []>} : vector<8x128xbf16>, vector<128x64xbf16>, vector<8x64xf32> -> vector<8x64xf32>
      %59 = arith.addf %51, %58 : vector<8x64xf32>
      %c3_i32_52 = arith.constant 3 : i32
      %60 = arith.addi %2, %c3_i32_52 : i32
      %c0_53 = arith.constant 0 : index
      %61 = arith.index_cast %60 : i32 to index
      %c1_54 = arith.constant 1 : index
      %c0_55 = arith.constant 0 : index
      %62 = vector.load %arg1[%c0_53, %61, %c1_54, %c0_55] : memref<1x8x9x128xbf16, #tpu.memory_space<vmem>>, vector<1x1x8x128xbf16>
      %63 = vector.shape_cast %62 : vector<1x1x8x128xbf16> to vector<8x128xbf16>
      %c7 = arith.constant 7 : index
      %c0_56 = arith.constant 0 : index
      %c0_57 = arith.constant 0 : index
      %64 = vector.load %arg2[%c7, %c0_56, %c0_57] : memref<8x128x64xbf16, #tpu.memory_space<vmem>>, vector<1x128x64xbf16>
      %65 = vector.shape_cast %64 : vector<1x128x64xbf16> to vector<128x64xbf16>
      %cst_58 = arith.constant dense<0.000000e+00> : vector<8x64xf32>
      %66 = tpu.matmul %63, %65, %cst_58 {dimension_numbers = #tpu.dot_dimension_numbers<[1], [0], [0], [1], [0, 0, 1, 1], [], []>} : vector<8x128xbf16>, vector<128x64xbf16>, vector<8x64xf32> -> vector<8x64xf32>
      %67 = arith.addf %59, %66 : vector<8x64xf32>
      %68 = vector.broadcast %0 : vector<1x64xf32> to vector<8x64xf32>
      %69 = arith.addf %67, %68 : vector<8x64xf32>
      %cst_59 = arith.constant 0.000000e+00 : f32
      %70 = vector.broadcast %cst_59 : f32 to vector<8x64xf32>
      %71 = arith.maximumf %69, %70 : vector<8x64xf32>
      %72 = vector.shape_cast %71 : vector<8x64xf32> to vector<1x8x64xf32>
      %73 = vector.extract_strided_slice %72 {offsets = [0, 0, 0], sizes = [1, 3, 64], strides = [1, 1, 1]} : vector<1x8x64xf32> to vector<1x3x64xf32>
      %74 = vector.shape_cast %73 : vector<1x3x64xf32> to vector<1x1x3x64xf32>
      %75 = arith.truncf %74 : vector<1x1x3x64xf32> to vector<1x1x3x64xbf16>
      %c0_60 = arith.constant 0 : index
      %76 = arith.index_cast %arg5 : i32 to index
      %c0_61 = arith.constant 0 : index
      %c0_62 = arith.constant 0 : index
      %77 = vector.load %arg4[%c0_60, %76, %c0_61, %c0_62] : memref<1x3x3x64xbf16, #tpu.memory_space<vmem>>, vector<1x1x3x64xbf16>
      tpu.vector_store %arg4[%c0_60, %76, %c0_61, %c0_62], %75 {strides = array<i32>} : memref<1x3x3x64xbf16, #tpu.memory_space<vmem>>, vector<1x1x3x64xbf16>,
    }
    %c3_i32_1 = arith.constant 3 : i32
    return
  }
  func.func @transform_0(%arg0: i32) -> (i32, i32, i32, i32) {
    %c0_i32 = arith.constant 0 : i32
    %c0_i32_0 = arith.constant 0 : i32
    %c0_i32_1 = arith.constant 0 : i32
    %c0_i32_2 = arith.constant 0 : i32
    return %arg0, %c0_i32, %c0_i32_0, %c0_i32_1 : i32, i32, i32, i32
  }
  func.func @transform_1(%arg0: i32) -> (i32, i32, i32) {
    %c0_i32 = arith.constant 0 : i32
    %c0_i32_0 = arith.constant 0 : i32
    %c0_i32_1 = arith.constant 0 : i32
    %c0_i32_2 = arith.constant 0 : i32
    return %c0_i32, %c0_i32_0, %c0_i32_1 : i32, i32, i32
  }
  func.func @transform_2(%arg0: i32) -> (i32, i32) {
    %c0_i32 = arith.constant 0 : i32
    %c0_i32_0 = arith.constant 0 : i32
    %c0_i32_1 = arith.constant 0 : i32
    return %c0_i32, %c0_i32_0 : i32, i32
  }
  func.func @transform_3(%arg0: i32) -> (i32, i32, i32, i32) {
    %c0_i32 = arith.constant 0 : i32
    %c0_i32_0 = arith.constant 0 : i32
    %c0_i32_1 = arith.constant 0 : i32
    %c0_i32_2 = arith.constant 0 : i32
    return %arg0, %c0_i32, %c0_i32_0, %c0_i32_1 : i32, i32, i32, i32
  }
}

module attributes {stable_mosaic.version = 11 : i64} {
  func.func @_conv_relu_kernel(%arg0: i32, %arg1: memref<1x3x10x64xbf16, #tpu.memory_space<vmem>>, %arg2: memref<9x64x64xbf16, #tpu.memory_space<vmem>>, %arg3: memref<1x64xf32, #tpu.memory_space<vmem>>, %arg4: memref<1x1x1x64xbf16, #tpu.memory_space<vmem>>) attributes {dimension_semantics = [#tpu.dimension_semantics<parallel>], iteration_bounds = array<i64: 2>, scalar_prefetch = 0 : i64, scratch_operands = 0 : i64, tpu.core_type = #tpu.core_type<tc>, window_params = [{transform_indices = @transform_0, window_bounds = array<i64: 1, 3, 10, 64>}, {pipeline_mode = #tpu.pipeline_mode<synchronous>, transform_indices = @transform_1, window_bounds = array<i64: 9, 64, 64>}, {pipeline_mode = #tpu.pipeline_mode<synchronous>, transform_indices = @transform_2, window_bounds = array<i64: 1, 64>}, {transform_indices = @transform_3, window_bounds = array<i64: 1, 1, 1, 64>}]} {
    %c0 = arith.constant 0 : index
    %c0_0 = arith.constant 0 : index
    %0 = vector.load %arg3[%c0, %c0_0] : memref<1x64xf32, #tpu.memory_space<vmem>>, vector<1x64xf32>
    %c0_i32 = arith.constant 0 : i32
    %c1_i32 = arith.constant 1 : i32
    %1 = arith.muli %c0_i32, %c1_i32 : i32
    %cst = arith.constant 0.000000e+00 : f32
    %2 = vector.broadcast %cst : f32 to vector<8x64xf32>
    %c0_i32_1 = arith.constant 0 : i32
    %3 = arith.addi %1, %c0_i32_1 : i32
    %c0_2 = arith.constant 0 : index
    %4 = arith.index_cast %3 : i32 to index
    %c0_3 = arith.constant 0 : index
    %c0_4 = arith.constant 0 : index
    %5 = vector.load %arg1[%c0_2, %4, %c0_3, %c0_4] : memref<1x3x10x64xbf16, #tpu.memory_space<vmem>>, vector<1x1x8x64xbf16>
    %6 = vector.shape_cast %5 : vector<1x1x8x64xbf16> to vector<8x64xbf16>
    %c0_5 = arith.constant 0 : index
    %c0_6 = arith.constant 0 : index
    %c0_7 = arith.constant 0 : index
    %7 = vector.load %arg2[%c0_5, %c0_6, %c0_7] : memref<9x64x64xbf16, #tpu.memory_space<vmem>>, vector<1x64x64xbf16>
    %8 = vector.shape_cast %7 : vector<1x64x64xbf16> to vector<64x64xbf16>
    %cst_8 = arith.constant dense<0.000000e+00> : vector<8x64xf32>
    %9 = tpu.matmul %6, %8, %cst_8 {dimension_numbers = #tpu.dot_dimension_numbers<[1], [0], [0], [1], [0, 0, 1, 1], [], []>} : vector<8x64xbf16>, vector<64x64xbf16>, vector<8x64xf32> -> vector<8x64xf32>
    %10 = arith.addf %2, %9 : vector<8x64xf32>
    %c0_i32_9 = arith.constant 0 : i32
    %11 = arith.addi %1, %c0_i32_9 : i32
    %c0_10 = arith.constant 0 : index
    %12 = arith.index_cast %11 : i32 to index
    %c1 = arith.constant 1 : index
    %c0_11 = arith.constant 0 : index
    %13 = vector.load %arg1[%c0_10, %12, %c1, %c0_11] : memref<1x3x10x64xbf16, #tpu.memory_space<vmem>>, vector<1x1x8x64xbf16>
    %14 = vector.shape_cast %13 : vector<1x1x8x64xbf16> to vector<8x64xbf16>
    %c1_12 = arith.constant 1 : index
    %c0_13 = arith.constant 0 : index
    %c0_14 = arith.constant 0 : index
    %15 = vector.load %arg2[%c1_12, %c0_13, %c0_14] : memref<9x64x64xbf16, #tpu.memory_space<vmem>>, vector<1x64x64xbf16>
    %16 = vector.shape_cast %15 : vector<1x64x64xbf16> to vector<64x64xbf16>
    %cst_15 = arith.constant dense<0.000000e+00> : vector<8x64xf32>
    %17 = tpu.matmul %14, %16, %cst_15 {dimension_numbers = #tpu.dot_dimension_numbers<[1], [0], [0], [1], [0, 0, 1, 1], [], []>} : vector<8x64xbf16>, vector<64x64xbf16>, vector<8x64xf32> -> vector<8x64xf32>
    %18 = arith.addf %10, %17 : vector<8x64xf32>
    %c0_i32_16 = arith.constant 0 : i32
    %19 = arith.addi %1, %c0_i32_16 : i32
    %c0_17 = arith.constant 0 : index
    %20 = arith.index_cast %19 : i32 to index
    %c2 = arith.constant 2 : index
    %c0_18 = arith.constant 0 : index
    %21 = vector.load %arg1[%c0_17, %20, %c2, %c0_18] : memref<1x3x10x64xbf16, #tpu.memory_space<vmem>>, vector<1x1x8x64xbf16>
    %22 = vector.shape_cast %21 : vector<1x1x8x64xbf16> to vector<8x64xbf16>
    %c2_19 = arith.constant 2 : index
    %c0_20 = arith.constant 0 : index
    %c0_21 = arith.constant 0 : index
    %23 = vector.load %arg2[%c2_19, %c0_20, %c0_21] : memref<9x64x64xbf16, #tpu.memory_space<vmem>>, vector<1x64x64xbf16>
    %24 = vector.shape_cast %23 : vector<1x64x64xbf16> to vector<64x64xbf16>
    %cst_22 = arith.constant dense<0.000000e+00> : vector<8x64xf32>
    %25 = tpu.matmul %22, %24, %cst_22 {dimension_numbers = #tpu.dot_dimension_numbers<[1], [0], [0], [1], [0, 0, 1, 1], [], []>} : vector<8x64xbf16>, vector<64x64xbf16>, vector<8x64xf32> -> vector<8x64xf32>
    %26 = arith.addf %18, %25 : vector<8x64xf32>
    %c1_i32_23 = arith.constant 1 : i32
    %27 = arith.addi %1, %c1_i32_23 : i32
    %c0_24 = arith.constant 0 : index
    %28 = arith.index_cast %27 : i32 to index
    %c0_25 = arith.constant 0 : index
    %c0_26 = arith.constant 0 : index
    %29 = vector.load %arg1[%c0_24, %28, %c0_25, %c0_26] : memref<1x3x10x64xbf16, #tpu.memory_space<vmem>>, vector<1x1x8x64xbf16>
    %30 = vector.shape_cast %29 : vector<1x1x8x64xbf16> to vector<8x64xbf16>
    %c3 = arith.constant 3 : index
    %c0_27 = arith.constant 0 : index
    %c0_28 = arith.constant 0 : index
    %31 = vector.load %arg2[%c3, %c0_27, %c0_28] : memref<9x64x64xbf16, #tpu.memory_space<vmem>>, vector<1x64x64xbf16>
    %32 = vector.shape_cast %31 : vector<1x64x64xbf16> to vector<64x64xbf16>
    %cst_29 = arith.constant dense<0.000000e+00> : vector<8x64xf32>
    %33 = tpu.matmul %30, %32, %cst_29 {dimension_numbers = #tpu.dot_dimension_numbers<[1], [0], [0], [1], [0, 0, 1, 1], [], []>} : vector<8x64xbf16>, vector<64x64xbf16>, vector<8x64xf32> -> vector<8x64xf32>
    %34 = arith.addf %26, %33 : vector<8x64xf32>
    %c1_i32_30 = arith.constant 1 : i32
    %35 = arith.addi %1, %c1_i32_30 : i32
    %c0_31 = arith.constant 0 : index
    %36 = arith.index_cast %35 : i32 to index
    %c1_32 = arith.constant 1 : index
    %c0_33 = arith.constant 0 : index
    %37 = vector.load %arg1[%c0_31, %36, %c1_32, %c0_33] : memref<1x3x10x64xbf16, #tpu.memory_space<vmem>>, vector<1x1x8x64xbf16>
    %38 = vector.shape_cast %37 : vector<1x1x8x64xbf16> to vector<8x64xbf16>
    %c4 = arith.constant 4 : index
    %c0_34 = arith.constant 0 : index
    %c0_35 = arith.constant 0 : index
    %39 = vector.load %arg2[%c4, %c0_34, %c0_35] : memref<9x64x64xbf16, #tpu.memory_space<vmem>>, vector<1x64x64xbf16>
    %40 = vector.shape_cast %39 : vector<1x64x64xbf16> to vector<64x64xbf16>
    %cst_36 = arith.constant dense<0.000000e+00> : vector<8x64xf32>
    %41 = tpu.matmul %38, %40, %cst_36 {dimension_numbers = #tpu.dot_dimension_numbers<[1], [0], [0], [1], [0, 0, 1, 1], [], []>} : vector<8x64xbf16>, vector<64x64xbf16>, vector<8x64xf32> -> vector<8x64xf32>
    %42 = arith.addf %34, %41 : vector<8x64xf32>
    %c1_i32_37 = arith.constant 1 : i32
    %43 = arith.addi %1, %c1_i32_37 : i32
    %c0_38 = arith.constant 0 : index
    %44 = arith.index_cast %43 : i32 to index
    %c2_39 = arith.constant 2 : index
    %c0_40 = arith.constant 0 : index
    %45 = vector.load %arg1[%c0_38, %44, %c2_39, %c0_40] : memref<1x3x10x64xbf16, #tpu.memory_space<vmem>>, vector<1x1x8x64xbf16>
    %46 = vector.shape_cast %45 : vector<1x1x8x64xbf16> to vector<8x64xbf16>
    %c5 = arith.constant 5 : index
    %c0_41 = arith.constant 0 : index
    %c0_42 = arith.constant 0 : index
    %47 = vector.load %arg2[%c5, %c0_41, %c0_42] : memref<9x64x64xbf16, #tpu.memory_space<vmem>>, vector<1x64x64xbf16>
    %48 = vector.shape_cast %47 : vector<1x64x64xbf16> to vector<64x64xbf16>
    %cst_43 = arith.constant dense<0.000000e+00> : vector<8x64xf32>
    %49 = tpu.matmul %46, %48, %cst_43 {dimension_numbers = #tpu.dot_dimension_numbers<[1], [0], [0], [1], [0, 0, 1, 1], [], []>} : vector<8x64xbf16>, vector<64x64xbf16>, vector<8x64xf32> -> vector<8x64xf32>
    %50 = arith.addf %42, %49 : vector<8x64xf32>
    %c2_i32 = arith.constant 2 : i32
    %51 = arith.addi %1, %c2_i32 : i32
    %c0_44 = arith.constant 0 : index
    %52 = arith.index_cast %51 : i32 to index
    %c0_45 = arith.constant 0 : index
    %c0_46 = arith.constant 0 : index
    %53 = vector.load %arg1[%c0_44, %52, %c0_45, %c0_46] : memref<1x3x10x64xbf16, #tpu.memory_space<vmem>>, vector<1x1x8x64xbf16>
    %54 = vector.shape_cast %53 : vector<1x1x8x64xbf16> to vector<8x64xbf16>
    %c6 = arith.constant 6 : index
    %c0_47 = arith.constant 0 : index
    %c0_48 = arith.constant 0 : index
    %55 = vector.load %arg2[%c6, %c0_47, %c0_48] : memref<9x64x64xbf16, #tpu.memory_space<vmem>>, vector<1x64x64xbf16>
    %56 = vector.shape_cast %55 : vector<1x64x64xbf16> to vector<64x64xbf16>
    %cst_49 = arith.constant dense<0.000000e+00> : vector<8x64xf32>
    %57 = tpu.matmul %54, %56, %cst_49 {dimension_numbers = #tpu.dot_dimension_numbers<[1], [0], [0], [1], [0, 0, 1, 1], [], []>} : vector<8x64xbf16>, vector<64x64xbf16>, vector<8x64xf32> -> vector<8x64xf32>
    %58 = arith.addf %50, %57 : vector<8x64xf32>
    %c2_i32_50 = arith.constant 2 : i32
    %59 = arith.addi %1, %c2_i32_50 : i32
    %c0_51 = arith.constant 0 : index
    %60 = arith.index_cast %59 : i32 to index
    %c1_52 = arith.constant 1 : index
    %c0_53 = arith.constant 0 : index
    %61 = vector.load %arg1[%c0_51, %60, %c1_52, %c0_53] : memref<1x3x10x64xbf16, #tpu.memory_space<vmem>>, vector<1x1x8x64xbf16>
    %62 = vector.shape_cast %61 : vector<1x1x8x64xbf16> to vector<8x64xbf16>
    %c7 = arith.constant 7 : index
    %c0_54 = arith.constant 0 : index
    %c0_55 = arith.constant 0 : index
    %63 = vector.load %arg2[%c7, %c0_54, %c0_55] : memref<9x64x64xbf16, #tpu.memory_space<vmem>>, vector<1x64x64xbf16>
    %64 = vector.shape_cast %63 : vector<1x64x64xbf16> to vector<64x64xbf16>
    %cst_56 = arith.constant dense<0.000000e+00> : vector<8x64xf32>
    %65 = tpu.matmul %62, %64, %cst_56 {dimension_numbers = #tpu.dot_dimension_numbers<[1], [0], [0], [1], [0, 0, 1, 1], [], []>} : vector<8x64xbf16>, vector<64x64xbf16>, vector<8x64xf32> -> vector<8x64xf32>
    %66 = arith.addf %58, %65 : vector<8x64xf32>
    %c2_i32_57 = arith.constant 2 : i32
    %67 = arith.addi %1, %c2_i32_57 : i32
    %c0_58 = arith.constant 0 : index
    %68 = arith.index_cast %67 : i32 to index
    %c2_59 = arith.constant 2 : index
    %c0_60 = arith.constant 0 : index
    %69 = vector.load %arg1[%c0_58, %68, %c2_59, %c0_60] : memref<1x3x10x64xbf16, #tpu.memory_space<vmem>>, vector<1x1x8x64xbf16>
    %70 = vector.shape_cast %69 : vector<1x1x8x64xbf16> to vector<8x64xbf16>
    %c8 = arith.constant 8 : index
    %c0_61 = arith.constant 0 : index
    %c0_62 = arith.constant 0 : index
    %71 = vector.load %arg2[%c8, %c0_61, %c0_62] : memref<9x64x64xbf16, #tpu.memory_space<vmem>>, vector<1x64x64xbf16>
    %72 = vector.shape_cast %71 : vector<1x64x64xbf16> to vector<64x64xbf16>
    %cst_63 = arith.constant dense<0.000000e+00> : vector<8x64xf32>
    %73 = tpu.matmul %70, %72, %cst_63 {dimension_numbers = #tpu.dot_dimension_numbers<[1], [0], [0], [1], [0, 0, 1, 1], [], []>} : vector<8x64xbf16>, vector<64x64xbf16>, vector<8x64xf32> -> vector<8x64xf32>
    %74 = arith.addf %66, %73 : vector<8x64xf32>
    %75 = vector.broadcast %0 : vector<1x64xf32> to vector<8x64xf32>
    %76 = arith.addf %74, %75 : vector<8x64xf32>
    %cst_64 = arith.constant 0.000000e+00 : f32
    %77 = vector.broadcast %cst_64 : f32 to vector<8x64xf32>
    %78 = arith.maximumf %76, %77 : vector<8x64xf32>
    %79 = vector.shape_cast %78 : vector<8x64xf32> to vector<1x8x64xf32>
    %80 = vector.extract_strided_slice %79 {offsets = [0, 0, 0], sizes = [1, 1, 64], strides = [1, 1, 1]} : vector<1x8x64xf32> to vector<1x1x64xf32>
    %81 = vector.shape_cast %80 : vector<1x1x64xf32> to vector<1x1x1x64xf32>
    %82 = arith.truncf %81 : vector<1x1x1x64xf32> to vector<1x1x1x64xbf16>
    %c0_65 = arith.constant 0 : index
    %83 = arith.index_cast %c0_i32 : i32 to index
    %c0_66 = arith.constant 0 : index
    %c0_67 = arith.constant 0 : index
    %84 = vector.load %arg4[%c0_65, %83, %c0_66, %c0_67] : memref<1x1x1x64xbf16, #tpu.memory_space<vmem>>, vector<1x1x1x64xbf16>
    tpu.vector_store %arg4[%c0_65, %83, %c0_66, %c0_67], %82 {strides = array<i32>} : memref<1x1x1x64xbf16, #tpu.memory_space<vmem>>, vector<1x1x1x64xbf16>,
    %c1_i32_68 = arith.constant 1 : i32
    return
  }
  func.func @transform_0(%arg0: i32) -> (i32, i32, i32, i32) {
    %c0_i32 = arith.constant 0 : i32
    %c0_i32_0 = arith.constant 0 : i32
    %c0_i32_1 = arith.constant 0 : i32
    %c0_i32_2 = arith.constant 0 : i32
    return %arg0, %c0_i32, %c0_i32_0, %c0_i32_1 : i32, i32, i32, i32
  }
  func.func @transform_1(%arg0: i32) -> (i32, i32, i32) {
    %c0_i32 = arith.constant 0 : i32
    %c0_i32_0 = arith.constant 0 : i32
    %c0_i32_1 = arith.constant 0 : i32
    %c0_i32_2 = arith.constant 0 : i32
    return %c0_i32, %c0_i32_0, %c0_i32_1 : i32, i32, i32
  }
  func.func @transform_2(%arg0: i32) -> (i32, i32) {
    %c0_i32 = arith.constant 0 : i32
    %c0_i32_0 = arith.constant 0 : i32
    %c0_i32_1 = arith.constant 0 : i32
    return %c0_i32, %c0_i32_0 : i32, i32
  }
  func.func @transform_3(%arg0: i32) -> (i32, i32, i32, i32) {
    %c0_i32 = arith.constant 0 : i32
    %c0_i32_0 = arith.constant 0 : i32
    %c0_i32_1 = arith.constant 0 : i32
    %c0_i32_2 = arith.constant 0 : i32
    return %arg0, %c0_i32, %c0_i32_0, %c0_i32_1 : i32, i32, i32, i32
  }
}

module attributes {stable_mosaic.version = 11 : i64} {
  func.func @_mlp_head_kernel(%arg0: i32, %arg1: memref<8x64xbf16, #tpu.memory_space<vmem>>, %arg2: memref<64x512xbf16, #tpu.memory_space<vmem>>, %arg3: memref<1x512xf32, #tpu.memory_space<vmem>>, %arg4: memref<512x128xbf16, #tpu.memory_space<vmem>>, %arg5: memref<1x128xf32, #tpu.memory_space<vmem>>, %arg6: memref<8x128xf32, #tpu.memory_space<vmem>>) attributes {dimension_semantics = [#tpu.dimension_semantics<parallel>], iteration_bounds = array<i64: 1>, scalar_prefetch = 0 : i64, scratch_operands = 0 : i64, tpu.core_type = #tpu.core_type<tc>, window_params = [{transform_indices = @transform_0, window_bounds = array<i64: 8, 64>}, {pipeline_mode = #tpu.pipeline_mode<synchronous>, transform_indices = @transform_1, window_bounds = array<i64: 64, 512>}, {pipeline_mode = #tpu.pipeline_mode<synchronous>, transform_indices = @transform_2, window_bounds = array<i64: 1, 512>}, {pipeline_mode = #tpu.pipeline_mode<synchronous>, transform_indices = @transform_3, window_bounds = array<i64: 512, 128>}, {pipeline_mode = #tpu.pipeline_mode<synchronous>, transform_indices = @transform_4, window_bounds = array<i64: 1, 128>}, {transform_indices = @transform_5, window_bounds = array<i64: 8, 128>}]} {
    %c0 = arith.constant 0 : index
    %c0_0 = arith.constant 0 : index
    %0 = vector.load %arg1[%c0, %c0_0] : memref<8x64xbf16, #tpu.memory_space<vmem>>, vector<8x64xbf16>
    %c0_1 = arith.constant 0 : index
    %c0_2 = arith.constant 0 : index
    %1 = vector.load %arg2[%c0_1, %c0_2] : memref<64x512xbf16, #tpu.memory_space<vmem>>, vector<64x512xbf16>
    %cst = arith.constant dense<0.000000e+00> : vector<8x512xf32>
    %2 = tpu.matmul %0, %1, %cst {dimension_numbers = #tpu.dot_dimension_numbers<[1], [0], [0], [1], [0, 0, 1, 1], [], []>} : vector<8x64xbf16>, vector<64x512xbf16>, vector<8x512xf32> -> vector<8x512xf32>
    %c0_3 = arith.constant 0 : index
    %c0_4 = arith.constant 0 : index
    %3 = vector.load %arg3[%c0_3, %c0_4] : memref<1x512xf32, #tpu.memory_space<vmem>>, vector<1x512xf32>
    %4 = vector.broadcast %3 : vector<1x512xf32> to vector<8x512xf32>
    %5 = arith.addf %2, %4 : vector<8x512xf32>
    %cst_5 = arith.constant 0.000000e+00 : f32
    %6 = vector.broadcast %cst_5 : f32 to vector<8x512xf32>
    %7 = arith.maximumf %5, %6 : vector<8x512xf32>
    %8 = arith.truncf %7 : vector<8x512xf32> to vector<8x512xbf16>
    %c0_6 = arith.constant 0 : index
    %c0_7 = arith.constant 0 : index
    %9 = vector.load %arg4[%c0_6, %c0_7] : memref<512x128xbf16, #tpu.memory_space<vmem>>, vector<512x128xbf16>
    %cst_8 = arith.constant dense<0.000000e+00> : vector<8x128xf32>
    %10 = tpu.matmul %8, %9, %cst_8 {dimension_numbers = #tpu.dot_dimension_numbers<[1], [0], [0], [1], [0, 0, 1, 1], [], []>} : vector<8x512xbf16>, vector<512x128xbf16>, vector<8x128xf32> -> vector<8x128xf32>
    %c0_9 = arith.constant 0 : index
    %c0_10 = arith.constant 0 : index
    %11 = vector.load %arg5[%c0_9, %c0_10] : memref<1x128xf32, #tpu.memory_space<vmem>>, vector<1x128xf32>
    %12 = vector.broadcast %11 : vector<1x128xf32> to vector<8x128xf32>
    %13 = arith.addf %10, %12 : vector<8x128xf32>
    %c0_11 = arith.constant 0 : index
    %c0_12 = arith.constant 0 : index
    %14 = vector.load %arg6[%c0_11, %c0_12] : memref<8x128xf32, #tpu.memory_space<vmem>>, vector<8x128xf32>
    tpu.vector_store %arg6[%c0_11, %c0_12], %13 {strides = array<i32>} : memref<8x128xf32, #tpu.memory_space<vmem>>, vector<8x128xf32>,
    return
  }
  func.func @transform_0(%arg0: i32) -> (i32, i32) {
    %c0_i32 = arith.constant 0 : i32
    %c0_i32_0 = arith.constant 0 : i32
    return %arg0, %c0_i32 : i32, i32
  }
  func.func @transform_1(%arg0: i32) -> (i32, i32) {
    %c0_i32 = arith.constant 0 : i32
    %c0_i32_0 = arith.constant 0 : i32
    %c0_i32_1 = arith.constant 0 : i32
    return %c0_i32, %c0_i32_0 : i32, i32
  }
  func.func @transform_2(%arg0: i32) -> (i32, i32) {
    %c0_i32 = arith.constant 0 : i32
    %c0_i32_0 = arith.constant 0 : i32
    %c0_i32_1 = arith.constant 0 : i32
    return %c0_i32, %c0_i32_0 : i32, i32
  }
  func.func @transform_3(%arg0: i32) -> (i32, i32) {
    %c0_i32 = arith.constant 0 : i32
    %c0_i32_0 = arith.constant 0 : i32
    %c0_i32_1 = arith.constant 0 : i32
    return %c0_i32, %c0_i32_0 : i32, i32
  }
  func.func @transform_4(%arg0: i32) -> (i32, i32) {
    %c0_i32 = arith.constant 0 : i32
    %c0_i32_0 = arith.constant 0 : i32
    %c0_i32_1 = arith.constant 0 : i32
    return %c0_i32, %c0_i32_0 : i32, i32
  }
  func.func @transform_5(%arg0: i32) -> (i32, i32) {
    %c0_i32 = arith.constant 0 : i32
    %c0_i32_0 = arith.constant 0 : i32
    return %arg0, %c0_i32 : i32, i32
  }
}

</mosaic_0001>

<bundles_post_ra>
// kernel: nature_cnn_forward.4
= control target key start
LH: loop header
LB: loop body
LE: loop exit
PB: predicated region body
PF: predicated region fallthrough
CT: control target
= control target key end

     0   :  { %s1500_s12 = smov 0   ;;  %s1669_s0 = inlined_call_operand.vmem [shape: f32[2,36,9,16], index: 0, kind: input, shape index: {}]   ;;  %s1670_s1 = inlined_call_operand.vmem [shape: bf16[16,16,64], index: 1, kind: input, shape index: {}]   ;;  %s1671_s2 = inlined_call_operand.vmem [shape: f32[1,64], index: 2, kind: input, shape index: {}]   ;;  %s1672_s3 = inlined_call_operand.vmem [shape: bf16[2,8,8,64], index: 3, kind: output, shape index: {}]  }
   0x1 LB: > { %s1186_s13 = sadd.s32 4294967295, %s1472_s12   ;;  %p1190_p0 = scmp.ge.s32.totalorder %s1472_s12, 1  ;;  %s1472_s12 = sphi %s1500_s12, %s13_s12  }
   0x2   : > { %p137_p1 = scmp.lt.s32.totalorder %s1472_s12, 3 }
   0x4   : > { %p138_p2 = pnand %p1190_p0, %p137_p1 }
   0x5   : > { %p161_p3 = scmp.lt.s32.totalorder (!%p138_p2), %s1186_s13, 1  ;;  %v1511_v0 = vld [vmem:[%s1671_s2] ss:$0 sm:$0xff] (!%p138_p2)  ;;  %s1523_s24 = smov (!%p138_p2), 0  }
   0x6   : > { %141 = sbr.rel (%p138_p2) target bundleno = 301 (0x12d), region = 32 }
   0xd   : > { %s1674_s13 = smov (!%p161_p3, %s1186_s13), 1 }
   0xe   : > { %s1427_s16 = smul.u32 576, %s1674_s13  ;;  %s1290_s17 = sshll.u32 %s1674_s13, 5 }
   0xf   : > { %s1516_s20 = scalar_lea.vmem %s1672_s3, %s1290_s17 }
  0x10   : > { %s1521_s23 = scalar_lea.vmem %s1669_s0, %s1427_s16 }
  0x11 LB: >> { %v1446_v1 = vld [vmem:[%s1670_s1 + $0x8] sm:$0xff]   ;;  %v1478_v2 = vmov 0.0   ;;  %v1447_v3 = vld [vmem:[%s1670_s1] sm:$0xff]   ;;  %vm1479_vm0 = vmmov 0   ;;  %s1291_s29 = sshll.u32 %s1476_s24, 6  ;;  %v1448_v4 = vld [vmem:[%s1670_s1 + $0x10] sm:$0xff]   ;;  %s1476_s24 = sphi %s1523_s24, %s178_s24  }
  0x12   : >> { %1331 = vmatprep.subr.bf16.mxu0 %v1478_v2  ;;  %1337 = vmatprep.subr.bf16.mxu1 %v1478_v2  ;;  %s1542_s30 = scalar_lea.vmem %s1521_s23, %s1291_s29  ;;  %vm197_vm1 = vcmask 130048   ;;  %v1449_v7 = vld [vmem:[%s1670_s1 + $0x18] sm:$0xff]   ;;  %v1450_v14 = vld [vmem:[%s1670_s1 + $0x20] sm:$0xff]   ;;  %v1451_v15 = vld [vmem:[%s1670_s1 + $0x28] sm:$0xff]   ;;  %vm1092_vm2 = vcmask 519168  }
  0x13   : >> { %1332 = vmatpush3.bf16.msra.mxu0 %v1446_v1  ;;  %1333 = vmatprep.mubr.msk.bf16.mxu0 %vm1479_vm0, %v1478_v2  ;;  %v186_v5 = vld [vmem:[%s1542_s30 + $0x1] sm:$0xff]  ;;  %v1204_v10 = vld [vmem:[%s1542_s30 + $0x10] sm:$0xff]  ;;  %v1453_v21 = vld [vmem:[%s1670_s1 + $0x38] sm:$0xff]  }
  0x14   : >> { %1338 = vmatpush3.bf16.msra.mxu1 %v1447_v3  ;;  %1339 = vmatprep.mubr.msk.bf16.mxu1 %vm1479_vm0, %v1478_v2  ;;  %v182_v6 = vld [vmem:[%s1542_s30] sm:$0xff]  ;;  %v187_v8 = vpack.c.bf16 %v186_v5, %v186_v5  ;;  %v1209_v11 = vld [vmem:[%s1542_s30 + $0x11] sm:$0xff]  ;;  %v294_v12 = vpack.c.bf16 %v1204_v10, %v1204_v10  ;;  %v1455_v27 = vld [vmem:[%s1670_s1 + $0x48] sm:$0xff]  }
  0x15   : >> { %1343 = vmatprep.subr.bf16.mxu0 %v1478_v2  ;;  %1349 = vmatprep.subr.bf16.mxu1 %v1478_v2  ;;  %v183_v9 = vpack.c.bf16 %v182_v6, %v182_v6  ;;  %v349_v13 = vpack.c.bf16 %v1209_v11, %v1209_v11  ;;  %v1216_v16 = vld [vmem:[%s1542_s30 + $0x20] sm:$0xff]  ;;  %v1452_v20 = vld [vmem:[%s1670_s1 + $0x30] sm:$0xff]   ;;  %v1457_v33 = vld [vmem:[%s1670_s1 + $0x58] sm:$0xff]  }
  0x16   : >> { %1334 = vmatmul.mubr.msk.bf16.vlgmr.msra.gmra.mrb[0].mxu0 %vm197_vm1, %v187_v8  ;;  %v1221_v17 = vld [vmem:[%s1542_s30 + $0x21] sm:$0xff]  ;;  %v407_v18 = vpack.c.bf16 %v1216_v16, %v1216_v16  ;;  %v1228_v22 = vld [vmem:[%s1542_s30 + $0x30] sm:$0xff]  ;;  %v1461_v45 = vld [vmem:[%s1670_s1 + $0x78] sm:$0xff]  }
  0x17   : >> { %1340 = vmatmul.mubr.msk.bf16.vlgmr.msra.gmra.mrb[0].mxu1 %vm197_vm1, %v183_v9  ;;  %1344 = vmatpush3.bf16.msra.mxu0 %v1448_v4  ;;  %v462_v19 = vpack.c.bf16 %v1221_v17, %v1221_v17  ;;  %v1233_v23 = vld [vmem:[%s1542_s30 + $0x31] sm:$0xff]  ;;  %v520_v24 = vpack.c.bf16 %v1228_v22, %v1228_v22  ;;  %v1454_v26 = vld [vmem:[%s1670_s1 + $0x40] sm:$0xff]   ;;  %v1459_v39 = vld [vmem:[%s1670_s1 + $0x68] sm:$0xff]  }
  0x18   : >> { %1350 = vmatpush3.bf16.msra.mxu1 %v1449_v7  ;;  %1345 = vmatprep.mubr.msk.bf16.mxu0 %vm1479_vm0, %v1478_v2  ;;  %v575_v25 = vpack.c.bf16 %v1233_v23, %v1233_v23  ;;  %v1240_v28 = vld [vmem:[%s1542_s30 + $0x40] sm:$0xff]  ;;  %v1456_v32 = vld [vmem:[%s1670_s1 + $0x50] sm:$0xff]  }
  0x19   : >> { %1351 = vmatprep.mubr.msk.bf16.mxu1 %vm1479_vm0, %v1478_v2  ;;  %1355 = vmatprep.subr.bf16.mxu0 %v1478_v2  ;;  %v1245_v29 = vld [vmem:[%s1542_s30 + $0x41] sm:$0xff]  ;;  %v633_v30 = vpack.c.bf16 %v1240_v28, %v1240_v28  ;;  %v1252_v34 = vld [vmem:[%s1542_s30 + $0x50] sm:$0xff] }
  0x1a   : >> { %1361 = vmatprep.subr.bf16.mxu1 %v1478_v2  ;;  %v688_v31 = vpack.c.bf16 %v1245_v29, %v1245_v29  ;;  %v1257_v35 = vld [vmem:[%s1542_s30 + $0x51] sm:$0xff]  ;;  %v746_v36 = vpack.c.bf16 %v1252_v34, %v1252_v34  ;;  %v1458_v38 = vld [vmem:[%s1670_s1 + $0x60] sm:$0xff]  }
  0x1b   : >> { %v801_v37 = vpack.c.bf16 %v1257_v35, %v1257_v35  ;;  %v1264_v40 = vld [vmem:[%s1542_s30 + $0x60] sm:$0xff]  ;;  %v1460_v44 = vld [vmem:[%s1670_s1 + $0x70] sm:$0xff]  }
  0x1c   : >> { %v1269_v41 = vld [vmem:[%s1542_s30 + $0x61] sm:$0xff]  ;;  %v859_v42 = vpack.c.bf16 %v1264_v40, %v1264_v40  ;;  %v1276_v46 = vld [vmem:[%s1542_s30 + $0x70] sm:$0xff] }
  0x1d   : >> { %v914_v43 = vpack.c.bf16 %v1269_v41, %v1269_v41  ;;  %v1281_v47 = vld [vmem:[%s1542_s30 + $0x71] sm:$0xff]  ;;  %v972_v48 = vpack.c.bf16 %v1276_v46, %v1276_v46  ;;  %s1287_s30 = sshll.u32 %s1476_s24, 2  ;;  %s178_s24 = sadd.s32 1, %s1476_s24  }
  0x1e   : >> { %1346 = vmatmul.mubr.msk.bf16.vlgmr.msra.gmra.mrb[4].mxu0 %vm197_vm1, %v294_v12  ;;  %v1027_v49 = vpack.c.bf16 %v1281_v47, %v1281_v47  ;;  %s1091_s10 = scalar_lea.vmem %s1516_s20, %s1287_s30  ;;  %p175_p4 = scmp.ge.s32.totalorder %s178_s24, 8  }
  0x1f   : >> { %1352 = vmatmul.mubr.msk.bf16.vlgmr.msra.gmra.mrb[4].mxu1 %vm197_vm1, %v349_v13  ;;  %1356 = vmatpush3.bf16.msra.mxu0 %v1450_v14 }
  0x20   : >> { %1362 = vmatpush3.bf16.msra.mxu1 %v1451_v15  ;;  %1357 = vmatprep.mubr.msk.bf16.mxu0 %vm1479_vm0, %v1478_v2 }
  0x21   : >> { %1363 = vmatprep.mubr.msk.bf16.mxu1 %vm1479_vm0, %v1478_v2  ;;  %1367 = vmatprep.subr.bf16.mxu0 %v1478_v2 }
  0x22   : >> { %1373 = vmatprep.subr.bf16.mxu1 %v1478_v2 }
  0x26   : >> { %1358 = vmatmul.mubr.msk.bf16.vlgmr.msra.gmra.mrb[8].mxu0 %vm197_vm1, %v407_v18 }
  0x27   : >> { %1364 = vmatmul.mubr.msk.bf16.vlgmr.msra.gmra.mrb[8].mxu1 %vm197_vm1, %v462_v19  ;;  %1368 = vmatpush3.bf16.msra.mxu0 %v1452_v20 }
  0x28   : >> { %1374 = vmatpush3.bf16.msra.mxu1 %v1453_v21  ;;  %1369 = vmatprep.mubr.msk.bf16.mxu0 %vm1479_vm0, %v1478_v2 }
  0x29   : >> { %1375 = vmatprep.mubr.msk.bf16.mxu1 %vm1479_vm0, %v1478_v2  ;;  %1379 = vmatprep.subr.bf16.mxu0 %v1478_v2 }
  0x2a   : >> { %1385 = vmatprep.subr.bf16.mxu1 %v1478_v2 }
  0x2e   : >> { %1370 = vmatmul.mubr.msk.bf16.vlgmr.msra.gmra.mrb[12].mxu0 %vm197_vm1, %v520_v24 }
  0x2f   : >> { %1376 = vmatmul.mubr.msk.bf16.vlgmr.msra.gmra.mrb[12].mxu1 %vm197_vm1, %v575_v25  ;;  %1380 = vmatpush3.bf16.msra.mxu0 %v1454_v26 }
  0x30   : >> { %1386 = vmatpush3.bf16.msra.mxu1 %v1455_v27  ;;  %1381 = vmatprep.mubr.msk.bf16.mxu0 %vm1479_vm0, %v1478_v2 }
  0x31   : >> { %1387 = vmatprep.mubr.msk.bf16.mxu1 %vm1479_vm0, %v1478_v2  ;;  %1391 = vmatprep.subr.bf16.mxu0 %v1478_v2 }
  0x32   : >> { %1397 = vmatprep.subr.bf16.mxu1 %v1478_v2 }
  0x36   : >> { %1382 = vmatmul.mubr.msk.bf16.vlgmr.msra.gmra.mrb[16].mxu0 %vm197_vm1, %v633_v30 }
  0x37   : >> { %1388 = vmatmul.mubr.msk.bf16.vlgmr.msra.gmra.mrb[16].mxu1 %vm197_vm1, %v688_v31  ;;  %1392 = vmatpush3.bf16.msra.mxu0 %v1456_v32 }
  0x38   : >> { %1398 = vmatpush3.bf16.msra.mxu1 %v1457_v33  ;;  %1393 = vmatprep.mubr.msk.bf16.mxu0 %vm1479_vm0, %v1478_v2 }
  0x39   : >> { %1399 = vmatprep.mubr.msk.bf16.mxu1 %vm1479_vm0, %v1478_v2  ;;  %1403 = vmatprep.subr.bf16.mxu0 %v1478_v2 }
  0x3a   : >> { %1409 = vmatprep.subr.bf16.mxu1 %v1478_v2 }
  0x3e   : >> { %1394 = vmatmul.mubr.msk.bf16.vlgmr.msra.gmra.mrb[20].mxu0 %vm197_vm1, %v746_v36 }
  0x3f   : >> { %1400 = vmatmul.mubr.msk.bf16.vlgmr.msra.gmra.mrb[20].mxu1 %vm197_vm1, %v801_v37  ;;  %1404 = vmatpush3.bf16.msra.mxu0 %v1458_v38 }
  0x40   : >> { %1410 = vmatpush3.bf16.msra.mxu1 %v1459_v39  ;;  %1405 = vmatprep.mubr.msk.bf16.mxu0 %vm1479_vm0, %v1478_v2 }
  0x41   : >> { %1411 = vmatprep.mubr.msk.bf16.mxu1 %vm1479_vm0, %v1478_v2  ;;  %1415 = vmatprep.subr.bf16.mxu0 %v1478_v2 }
  0x42   : >> { %1421 = vmatprep.subr.bf16.mxu1 %v1478_v2 }
  0x46   : >> { %1406 = vmatmul.mubr.msk.bf16.vlgmr.msra.gmra.mrb[24].mxu0 %vm197_vm1, %v859_v42 }
  0x47   : >> { %1412 = vmatmul.mubr.msk.bf16.vlgmr.msra.gmra.mrb[24].mxu1 %vm197_vm1, %v914_v43  ;;  %1416 = vmatpush3.bf16.msra.mxu0 %v1460_v44 }
  0x48   : >> { %1422 = vmatpush3.bf16.msra.mxu1 %v1461_v45  ;;  %1417 = vmatprep.mubr.msk.bf16.mxu0 %vm1479_vm0, %v1478_v2 }
  0x49   : >> { %1423 = vmatprep.mubr.msk.bf16.mxu1 %vm1479_vm0, %v1478_v2 }
  0x4e   : >> { %1418 = vmatmul.mubr.msk.bf16.vlgmr.msra.gmra.mrb[28].mxu0 %vm197_vm1, %v972_v48 }
  0x4f   : >> { %1424 = vmatmul.mubr.msk.bf16.vlgmr.msra.gmra.mrb[28].mxu1 %vm197_vm1, %v1027_v49 }
  0xe9   : >> { %v235_v50 = vpop.f32.mrb[0].mxu0 }
  0xea   : >> { %v284_v51 = vpop.f32.mrb[0].mxu1  ;;  %v1335_v53 = vpop.f32.mrb[1].mxu0 }
  0xeb   : >> { %v285_v52 = vadd.f32 %v284_v51, %v235_v50  ;;  %v1341_v54 = vpop.f32.mrb[1].mxu1  ;;  %v238_v55 = vpop.f32.mrb[2].mxu0 }
  0xec   : >> { %v287_v56 = vpop.f32.mrb[2].mxu1  ;;  %v1336_v57 = vpop.f32.mrb[3].mxu0 }
  0xed   : >> { %v1342_v58 = vpop.f32.mrb[3].mxu1 }
  0xf1   : >> { %v341_v59 = vpop.f32.mrb[4].mxu0 }
  0xf2   : >> { %v396_v60 = vpop.f32.mrb[4].mxu1  ;;  %v347_v61 = vadd.f32 %v341_v59, %v285_v52  ;;  %v1347_v62 = vpop.f32.mrb[5].mxu0 }
  0xf3   : >> { %v1353_v63 = vpop.f32.mrb[5].mxu1  ;;  %v344_v1 = vpop.f32.mrb[6].mxu0 }
  0xf4   : >> { %v399_v2 = vpop.f32.mrb[6].mxu1  ;;  %v402_v3 = vadd.f32 %v396_v60, %v347_v61  ;;  %v1348_v4 = vpop.f32.mrb[7].mxu0 }
  0xf5   : >> { %v1354_v5 = vpop.f32.mrb[7].mxu1 }
  0xf9   : >> { %v454_v6 = vpop.f32.mrb[8].mxu0 }
  0xfa   : >> { %v509_v7 = vpop.f32.mrb[8].mxu1  ;;  %v460_v8 = vadd.f32 %v454_v6, %v402_v3  ;;  %v1359_v9 = vpop.f32.mrb[9].mxu0 }
  0xfb   : >> { %v1365_v10 = vpop.f32.mrb[9].mxu1  ;;  %v457_v11 = vpop.f32.mrb[10].mxu0 }
  0xfc   : >> { %v512_v12 = vpop.f32.mrb[10].mxu1  ;;  %v515_v13 = vadd.f32 %v509_v7, %v460_v8  ;;  %v1360_v14 = vpop.f32.mrb[11].mxu0 }
  0xfd   : >> { %v1366_v15 = vpop.f32.mrb[11].mxu1 }
 0x101   : >> { %v567_v16 = vpop.f32.mrb[12].mxu0 }
 0x102   : >> { %v622_v17 = vpop.f32.mrb[12].mxu1  ;;  %v573_v18 = vadd.f32 %v567_v16, %v515_v13  ;;  %v1371_v19 = vpop.f32.mrb[13].mxu0 }
 0x103   : >> { %v1377_v20 = vpop.f32.mrb[13].mxu1  ;;  %v570_v21 = vpop.f32.mrb[14].mxu0 }
 0x104   : >> { %v625_v22 = vpop.f32.mrb[14].mxu1  ;;  %v628_v23 = vadd.f32 %v622_v17, %v573_v18  ;;  %v1372_v24 = vpop.f32.mrb[15].mxu0 }
 0x105   : >> { %v1378_v25 = vpop.f32.mrb[15].mxu1 }
 0x109   : >> { %v680_v26 = vpop.f32.mrb[16].mxu0 }
 0x10a   : >> { %v735_v27 = vpop.f32.mrb[16].mxu1  ;;  %v686_v28 = vadd.f32 %v680_v26, %v628_v23  ;;  %v1383_v29 = vpop.f32.mrb[17].mxu0 }
 0x10b   : >> { %v1389_v30 = vpop.f32.mrb[17].mxu1  ;;  %v683_v31 = vpop.f32.mrb[18].mxu0 }
 0x10c   : >> { %v738_v32 = vpop.f32.mrb[18].mxu1  ;;  %v741_v33 = vadd.f32 %v735_v27, %v686_v28  ;;  %v1384_v34 = vpop.f32.mrb[19].mxu0 }
 0x10d   : >> { %v1390_v35 = vpop.f32.mrb[19].mxu1 }
 0x111   : >> { %v793_v36 = vpop.f32.mrb[20].mxu0 }
 0x112   : >> { %v848_v37 = vpop.f32.mrb[20].mxu1  ;;  %v799_v38 = vadd.f32 %v793_v36, %v741_v33  ;;  %v1395_v39 = vpop.f32.mrb[21].mxu0 }
 0x113   : >> { %v1401_v40 = vpop.f32.mrb[21].mxu1  ;;  %v796_v41 = vpop.f32.mrb[22].mxu0 }
 0x114   : >> { %v851_v42 = vpop.f32.mrb[22].mxu1  ;;  %v854_v43 = vadd.f32 %v848_v37, %v799_v38  ;;  %v1396_v44 = vpop.f32.mrb[23].mxu0 }
 0x115   : >> { %v1402_v45 = vpop.f32.mrb[23].mxu1 }
 0x119   : >> { %v906_v46 = vpop.f32.mrb[24].mxu0 }
 0x11a   : >> { %v961_v47 = vpop.f32.mrb[24].mxu1  ;;  %v912_v48 = vadd.f32 %v906_v46, %v854_v43  ;;  %v1407_v49 = vpop.f32.mrb[25].mxu0 }
 0x11b   : >> { %v1413_v50 = vpop.f32.mrb[25].mxu1  ;;  %v909_v51 = vpop.f32.mrb[26].mxu0 }
 0x11c   : >> { %v964_v52 = vpop.f32.mrb[26].mxu1  ;;  %v967_v53 = vadd.f32 %v961_v47, %v912_v48  ;;  %v1408_v54 = vpop.f32.mrb[27].mxu0 }
 0x11d   : >> { %v1414_v55 = vpop.f32.mrb[27].mxu1 }
 0x121   : >> { %v1019_v56 = vpop.f32.mrb[28].mxu0 }
 0x122   : >> { %v1074_v57 = vpop.f32.mrb[28].mxu1  ;;  %v1025_v58 = vadd.f32 %v1019_v56, %v967_v53  ;;  %v1419_v59 = vpop.f32.mrb[29].mxu0 }
 0x123   : >> { %v1425_v60 = vpop.f32.mrb[29].mxu1  ;;  %v1022_v61 = vpop.f32.mrb[30].mxu0 }
 0x124   : >> { %v1077_v62 = vpop.f32.mrb[30].mxu1  ;;  %v1080_v63 = vadd.f32 %v1074_v57, %v1025_v58  ;;  %v1420_v1 = vpop.f32.mrb[31].mxu0 }
 0x125   : >> { %v1426_v2 = vpop.f32.mrb[31].mxu1 }
 0x126   : >> { %v1087_v3 = vadd.f32 %v1511_v0, %v1080_v63  ;;  %177 = sbr.rel (!%p175_p4) target bundleno = 17 (0x11), region = 93 }
 0x128   : >> { %v1088_v4 = vmax.f32 %v1087_v3, 0.0 }
 0x12a   : >> { %v1089_v5 = vpack.c.bf16 %v1088_v4, %v1088_v4 }
 0x12c   : >> { %1093 = vst.msk [vmem:[%s1091_s10] sm:$0xf] %vm1092_vm2, %v1089_v5 }
 0x12d PF: > { %s13_s12 = sadd.s32 1, %s1472_s12  }
 0x12e   : > { %p10_p5 = scmp.ge.s32.totalorder %s13_s12, 4  }
 0x130   :  { %12 = sbr.rel (!%p10_p5) target bundleno = 1 (0x1), region = 104 }

// kernel: nature_cnn_forward.6
= control target key start
LH: loop header
LB: loop body
LE: loop exit
PB: predicated region body
PF: predicated region fallthrough
CT: control target
= control target key end

     0   :  { %s1351_s12 = smov 0   ;;  %s1559_s0 = inlined_call_operand.vmem [shape: bf16[2,3,10,64], index: 0, kind: input, shape index: {}]   ;;  %s1560_s1 = inlined_call_operand.vmem [shape: bf16[9,64,64], index: 1, kind: input, shape index: {}]   ;;  %s1561_s2 = inlined_call_operand.vmem [shape: f32[1,64], index: 2, kind: input, shape index: {}]   ;;  %s1562_s3 = inlined_call_operand.vmem [shape: bf16[2,1,1,64], index: 3, kind: output, shape index: {}]  }
   0x1 LB: > { %s983_s13 = sadd.s32 4294967295, %s1327_s12   ;;  %p987_p0 = scmp.ge.s32.totalorder %s1327_s12, 1  ;;  %s1327_s12 = sphi %s1351_s12, %s13_s12  }
   0x2   : > { %p137_p1 = scmp.lt.s32.totalorder %s1327_s12, 3 }
   0x4   : > { %p138_p2 = pnand %p987_p0, %p137_p1 }
   0x5   : > { %v1279_v0 = vld [vmem:[%s1560_s1 + $0x20] sm:$0xff] (!%p138_p2)   ;;  %v1329_v1 = vmov (!%p138_p2), 0.0   ;;  %v1281_v3 = vld [vmem:[%s1560_s1 + $0x28] sm:$0xff] (!%p138_p2)   ;;  %vm1330_vm0 = vmmov (!%p138_p2), 0   ;;  %p159_p3 = scmp.lt.s32.totalorder (!%p138_p2), %s983_s13, 1  ;;  %v1283_v5 = vld [vmem:[%s1560_s1 + $0x30] sm:$0xff] (!%p138_p2)  }
   0x6   : > { %141 = sbr.rel (%p138_p2) target bundleno = 312 (0x138), region = 32  ;;  %1160 = vmatprep.subr.bf16.mxu0 (!%p138_p2), %v1329_v1  ;;  %1172 = vmatprep.subr.bf16.mxu1 (!%p138_p2), %v1329_v1  ;;  %v1280_v2 = vld [vmem:[%s1560_s1] sm:$0xff] (!%p138_p2)   ;;  %v1282_v4 = vld [vmem:[%s1560_s1 + $0x8] sm:$0xff] (!%p138_p2)   ;;  %v1284_v6 = vld [vmem:[%s1560_s1 + $0x10] sm:$0xff] (!%p138_p2)   ;;  %vm224_vm1 = vcmask (!%p138_p2), 523264   ;;  %vm930_vm2 = vcmask (!%p138_p2), 516096  }
   0x7   : > { %1161 = vmatpush3.bf16.msra.mxu0 (!%p138_p2), %v1279_v0  ;;  %1168 = vmatprep.mubr.msk.bf16.mxu0 (!%p138_p2), %vm1330_vm0, %v1329_v1  ;;  %v1285_v9 = vld [vmem:[%s1560_s1 + $0x38] sm:$0xff] (!%p138_p2)   ;;  %v1288_v15 = vld [vmem:[%s1560_s1 + $0x40] sm:$0xff] (!%p138_p2)   ;;  %v1290_v18 = vld [vmem:[%s1560_s1 + $0x48] sm:$0xff] (!%p138_p2)   ;;  %vm931_vm3 = vsmask.f32 (!%p138_p2), 256 }
   0x8   : > { %1173 = vmatpush3.bf16.msra.mxu1 (!%p138_p2), %v1280_v2  ;;  %1162 = vmatprep.subr.bf16.mxu0 (!%p138_p2), %v1329_v1  ;;  %v1286_v11 = vld [vmem:[%s1560_s1 + $0x18] sm:$0xff] (!%p138_p2)   ;;  %v1289_v16 = vld [vmem:[%s1560_s1 + $0x60] sm:$0xff] (!%p138_p2)   ;;  %v1291_v19 = vld [vmem:[%s1560_s1 + $0x68] sm:$0xff] (!%p138_p2)  }
   0x9   : > { %1174 = vmatprep.subr.bf16.mxu1 (!%p138_p2), %v1329_v1  ;;  %1180 = vmatprep.mubr.msk.bf16.mxu1 (!%p138_p2), %vm1330_vm0, %v1329_v1  ;;  %v1292_v21 = vld [vmem:[%s1560_s1 + $0x50] sm:$0xff] (!%p138_p2)   ;;  %v1294_v24 = vld [vmem:[%s1560_s1 + $0x58] sm:$0xff] (!%p138_p2)   ;;  %v1297_v27 = vld [vmem:[%s1560_s1 + $0x80] sm:$0xff] (!%p138_p2)  }
   0xa   : > { %v1293_v22 = vld [vmem:[%s1560_s1 + $0x70] sm:$0xff] (!%p138_p2)   ;;  %v1295_v25 = vld [vmem:[%s1560_s1 + $0x78] sm:$0xff] (!%p138_p2)   ;;  %v1298_v29 = vld [vmem:[%s1560_s1 + $0xa0] sm:$0xff] (!%p138_p2)  }
   0xb   : > { %1163 = vmatpush3.bf16.msra.mxu0 (!%p138_p2), %v1281_v3  ;;  %v1299_v33 = vld [vmem:[%s1560_s1 + $0x88] sm:$0xff] (!%p138_p2)   ;;  %v1301_v36 = vld [vmem:[%s1560_s1 + $0x90] sm:$0xff] (!%p138_p2)   ;;  %v1303_v42 = vld [vmem:[%s1560_s1 + $0x98] sm:$0xff] (!%p138_p2)  }
   0xc   : > { %1175 = vmatpush3.bf16.msra.mxu1 (!%p138_p2), %v1282_v4  ;;  %1164 = vmatprep.subr.bf16.mxu0 (!%p138_p2), %v1329_v1  ;;  %v1300_v34 = vld [vmem:[%s1560_s1 + $0xa8] sm:$0xff] (!%p138_p2)   ;;  %v1302_v37 = vld [vmem:[%s1560_s1 + $0xb0] sm:$0xff] (!%p138_p2)   ;;  %v1304_v43 = vld [vmem:[%s1560_s1 + $0xb8] sm:$0xff] (!%p138_p2)  }
   0xd   : > { %s1564_s13 = smov (!%p159_p3, %s983_s13), 1  ;;  %1176 = vmatprep.subr.bf16.mxu1 %v1329_v1  ;;  %v1306_v45 = vld [vmem:[%s1560_s1 + $0xc0] sm:$0xff]   ;;  %v1309_v51 = vld [vmem:[%s1560_s1 + $0xc8] sm:$0xff]   ;;  %v1311_v54 = vld [vmem:[%s1560_s1 + $0xd0] sm:$0xff]  }
   0xe   : > { %s1268_s24 = smul.u32 24, %s1564_s13  ;;  %v1308_v47 = vld [vmem:[%s1560_s1 + $0xe0] sm:$0xff]   ;;  %v1310_v52 = vld [vmem:[%s1560_s1 + $0xe8] sm:$0xff]   ;;  %v1312_v55 = vld [vmem:[%s1560_s1 + $0xf0] sm:$0xff]   ;;  %s166_s20 = scalar_lea.vmem %s1562_s3, %s1564_s13 }
   0xf   : > { %1165 = vmatpush3.bf16.msra.mxu0 %v1283_v5  ;;  %v1313_v58 = vld [vmem:[%s1560_s1 + $0xd8] sm:$0xff]   ;;  %v1315_v62 = vld [vmem:[%s1560_s1 + $0x100] sm:$0xff]   ;;  %v1317_v63 = vld [vmem:[%s1560_s1 + $0x108] sm:$0xff]  }
  0x10   : > { %s1393_s29 = scalar_lea.vmem %s1559_s0, %s1268_s24  ;;  %1177 = vmatpush3.bf16.msra.mxu1 %v1284_v6  ;;  %1166 = vmatprep.subr.bf16.mxu0 %v1329_v1  ;;  %v1314_v59 = vld [vmem:[%s1560_s1 + $0xf8] sm:$0xff]   ;;  %v1318_v0 = vld [vmem:[%s1560_s1 + $0x110] sm:$0xff]   ;;  %vm932_vm4 = vmand %vm930_vm2, %vm931_vm3 }
  0x11   : > { %v169_v7 = vld [vmem:[%s1393_s29] sm:$0xf]  ;;  %v178_v8 = vld [vmem:[%s1393_s29 + $0x4] sm:$0x1]  ;;  %1178 = vmatprep.subr.bf16.mxu1 %v1329_v1  ;;  %v1022_v28 = vld [vmem:[%s1393_s29 + $0x8] sm:$0xf] }
  0x12   : > { %v997_v10 = vcombine.low %v169_v7, %v178_v8  ;;  %v335_v20 = vld [vmem:[%s1393_s29] sm:$0xe]  ;;  %v1036_v30 = vld [vmem:[%s1393_s29 + $0x8] sm:$0xf]  ;;  %v1037_v31 = vld [vmem:[%s1393_s29 + $0xc] sm:$0x1] }
  0x13   : > { %1167 = vmatpush3.bf16.msra.mxu0 %v1285_v9  ;;  %v1016_v23 = vcombine.low %v335_v20, %v178_v8  ;;  %v1046_v32 = vcombine.low %v1036_v30, %v1037_v31  ;;  %v1052_v38 = vld [vmem:[%s1393_s29 + $0x8] sm:$0xe]  ;;  %v1081_v48 = vld [vmem:[%s1393_s29 + $0x10] sm:$0xf]  ;;  %v1082_v49 = vld [vmem:[%s1393_s29 + $0x14] sm:$0x1] }
  0x14   : > { %v194_v12 = vshrl.u32 %v997_v10, 16  ;;  %v196_v13 = vshll.u32 %v997_v10, 16  ;;  %1179 = vmatpush3.bf16.msra.mxu1 %v1286_v11  ;;  %1184 = vmatprep.subr.bf16.mxu0 %v1329_v1  ;;  %v1061_v41 = vcombine.low %v1052_v38, %v1037_v31  ;;  %v1091_v50 = vcombine.low %v1081_v48, %v1082_v49  ;;  %v1067_v61 = vld [vmem:[%s1393_s29 + $0x10] sm:$0xf]  ;;  %v1319_v4 = vld [vmem:[%s1560_s1 + $0x118] sm:$0xff]  }
  0x15   : > { %1196 = vmatprep.subr.bf16.mxu1 %v1329_v1  ;;  %v348_v26 = vrot.slane %v1016_v23, 1  ;;  %v515_v35 = vshll.u32 %v1046_v32, 16  ;;  %v513_v39 = vshrl.u32 %v1046_v32, 16  ;;  %v1097_v2 = vld [vmem:[%s1393_s29 + $0x10] sm:$0xe] }
  0x16   : > { %v198_v14 = vrot.slane %v196_v13, 1  ;;  %v600_v46 = vrot.slane %v1061_v41, 1  ;;  %v767_v53 = vshll.u32 %v1091_v50, 16  ;;  %v765_v56 = vshrl.u32 %v1091_v50, 16 }
  0x17   : > { %1181 = vmatmul.mubr.msk.bf16.vlgmr.msra.gmra.mrb[0].mxu1 %vm224_vm1, %v169_v7  ;;  %v517_v40 = vrot.slane %v515_v35, 1  ;;  %v1106_v3 = vcombine.low %v1097_v2, %v1082_v49 }
  0x18   : > { %v199_v17 = vor.u32 %v198_v14, %v194_v12  ;;  %1197 = vmatpush3.bf16.msra.mxu1 %v1289_v16  ;;  %1204 = vmatprep.mubr.msk.bf16.mxu1 %vm1330_vm0, %v1329_v1  ;;  %v769_v57 = vrot.slane %v767_v53, 1 }
  0x19   : > { %1198 = vmatprep.subr.bf16.mxu1 %v1329_v1  ;;  %v518_v44 = vor.u32 %v517_v40, %v513_v39  ;;  %v852_v5 = vrot.slane %v1106_v3, 1 }
  0x1a   : > { %1169 = vmatmul.mubr.msk.bf16.vlgmr.msra.gmra.mrb[0].mxu0 %vm224_vm1, %v199_v17  ;;  %v770_v60 = vor.u32 %v769_v57, %v765_v56 }
  0x1b   : > { %1185 = vmatpush3.bf16.msra.mxu0 %v1288_v15  ;;  %1192 = vmatprep.mubr.msk.bf16.mxu0 %vm1330_vm0, %v1329_v1 }
  0x1c   : > { %1186 = vmatprep.subr.bf16.mxu0 %v1329_v1  ;;  %1199 = vmatpush3.bf16.msra.mxu1 %v1291_v19 }
  0x1d   : > { %1200 = vmatprep.subr.bf16.mxu1 %v1329_v1 }
  0x1f   : > { %1187 = vmatpush3.bf16.msra.mxu0 %v1290_v18 }
  0x20   : > { %1188 = vmatprep.subr.bf16.mxu0 %v1329_v1  ;;  %1201 = vmatpush3.bf16.msra.mxu1 %v1293_v22 }
  0x21   : > { %1202 = vmatprep.subr.bf16.mxu1 %v1329_v1 }
  0x23   : > { %1189 = vmatpush3.bf16.msra.mxu0 %v1292_v21 }
  0x24   : > { %1190 = vmatprep.subr.bf16.mxu0 %v1329_v1  ;;  %1203 = vmatpush3.bf16.msra.mxu1 %v1295_v25 }
  0x25   : > { %1220 = vmatprep.subr.bf16.mxu1 %v1329_v1 }
  0x27   : > { %1191 = vmatpush3.bf16.msra.mxu0 %v1294_v24  ;;  %1205 = vmatmul.mubr.msk.bf16.vlgmr.msra.gmra.mrb[4].mxu1 %vm224_vm1, %v1022_v28 }
  0x28   : > { %1208 = vmatprep.subr.bf16.mxu0 %v1329_v1  ;;  %1221 = vmatpush3.bf16.msra.mxu1 %v1298_v29 }
  0x29   : > { %1222 = vmatprep.subr.bf16.mxu1 %v1329_v1  ;;  %1228 = vmatprep.mubr.msk.bf16.mxu1 %vm1330_vm0, %v1329_v1 }
  0x2a   : > { %1193 = vmatmul.mubr.msk.bf16.vlgmr.msra.gmra.mrb[4].mxu0 %vm224_vm1, %v348_v26 }
  0x2b   : > { %1209 = vmatpush3.bf16.msra.mxu0 %v1297_v27  ;;  %1216 = vmatprep.mubr.msk.bf16.mxu0 %vm1330_vm0, %v1329_v1 }
  0x2c   : > { %1210 = vmatprep.subr.bf16.mxu0 %v1329_v1  ;;  %1223 = vmatpush3.bf16.msra.mxu1 %v1300_v34 }
  0x2d   : > { %1224 = vmatprep.subr.bf16.mxu1 %v1329_v1 }
  0x2f   : > { %1211 = vmatpush3.bf16.msra.mxu0 %v1299_v33 }
  0x30   : > { %1212 = vmatprep.subr.bf16.mxu0 %v1329_v1  ;;  %1225 = vmatpush3.bf16.msra.mxu1 %v1302_v37 }
  0x31   : > { %1226 = vmatprep.subr.bf16.mxu1 %v1329_v1 }
  0x33   : > { %1213 = vmatpush3.bf16.msra.mxu0 %v1301_v36 }
  0x34   : > { %1214 = vmatprep.subr.bf16.mxu0 %v1329_v1  ;;  %1227 = vmatpush3.bf16.msra.mxu1 %v1304_v43 }
  0x35   : > { %1244 = vmatprep.subr.bf16.mxu1 %v1329_v1 }
  0x37   : > { %1215 = vmatpush3.bf16.msra.mxu0 %v1303_v42  ;;  %1229 = vmatmul.mubr.msk.bf16.vlgmr.msra.gmra.mrb[8].mxu1 %vm224_vm1, %v600_v46 }
  0x38   : > { %1232 = vmatprep.subr.bf16.mxu0 %v1329_v1  ;;  %1245 = vmatpush3.bf16.msra.mxu1 %v1308_v47 }
  0x39   : > { %1246 = vmatprep.subr.bf16.mxu1 %v1329_v1  ;;  %1252 = vmatprep.mubr.msk.bf16.mxu1 %vm1330_vm0, %v1329_v1 }
  0x3a   : > { %1217 = vmatmul.mubr.msk.bf16.vlgmr.msra.gmra.mrb[8].mxu0 %vm224_vm1, %v518_v44  ;;  %v1112_v44 = vld [vmem:[%s1561_s2] ss:$0 sm:$0xff] }
  0x3b   : > { %1233 = vmatpush3.bf16.msra.mxu0 %v1306_v45  ;;  %1240 = vmatprep.mubr.msk.bf16.mxu0 %vm1330_vm0, %v1329_v1 }
  0x3c   : > { %1234 = vmatprep.subr.bf16.mxu0 %v1329_v1  ;;  %1247 = vmatpush3.bf16.msra.mxu1 %v1310_v52  ;;  %v933_v52 = vld [vmem:[%s166_s20] sm:$0x1] }
  0x3d   : > { %1248 = vmatprep.subr.bf16.mxu1 %v1329_v1 }
  0x3f   : > { %1235 = vmatpush3.bf16.msra.mxu0 %v1309_v51 }
  0x40   : > { %1236 = vmatprep.subr.bf16.mxu0 %v1329_v1  ;;  %1249 = vmatpush3.bf16.msra.mxu1 %v1312_v55 }
  0x41   : > { %1250 = vmatprep.subr.bf16.mxu1 %v1329_v1 }
  0x43   : > { %1237 = vmatpush3.bf16.msra.mxu0 %v1311_v54 }
  0x44   : > { %1238 = vmatprep.subr.bf16.mxu0 %v1329_v1  ;;  %1251 = vmatpush3.bf16.msra.mxu1 %v1314_v59 }
  0x47   : > { %1239 = vmatpush3.bf16.msra.mxu0 %v1313_v58  ;;  %1253 = vmatmul.mubr.msk.bf16.vlgmr.msra.gmra.mrb[12].mxu1 %vm224_vm1, %v770_v60 }
  0x48   : > { %1256 = vmatprep.subr.bf16.mxu0 %v1329_v1 }
  0x4a   : > { %1241 = vmatmul.mubr.msk.bf16.vlgmr.msra.gmra.mrb[12].mxu0 %vm224_vm1, %v1067_v61 }
  0x4b   : > { %1257 = vmatpush3.bf16.msra.mxu0 %v1315_v62  ;;  %1264 = vmatprep.mubr.msk.bf16.mxu0 %vm1330_vm0, %v1329_v1 }
  0x4c   : > { %1258 = vmatprep.subr.bf16.mxu0 %v1329_v1 }
  0x4f   : > { %1259 = vmatpush3.bf16.msra.mxu0 %v1317_v63 }
  0x50   : > { %1260 = vmatprep.subr.bf16.mxu0 %v1329_v1 }
  0x53   : > { %1261 = vmatpush3.bf16.msra.mxu0 %v1318_v0 }
  0x54   : > { %1262 = vmatprep.subr.bf16.mxu0 %v1329_v1 }
  0x57   : > { %1263 = vmatpush3.bf16.msra.mxu0 %v1319_v4 }
  0x5a   : > { %1265 = vmatmul.mubr.msk.bf16.vlgmr.msra.gmra.mrb[16].mxu0 %vm224_vm1, %v852_v5 }
  0xea   : > { %v329_v7 = vpop.f32.mrb[0].mxu1 }
  0xeb   : > { %v1182_v10 = vpop.f32.mrb[1].mxu1 }
  0xec   : > { %v332_v12 = vpop.f32.mrb[2].mxu1 }
  0xed   : > { %v262_v6 = vpop.f32.mrb[0].mxu0  ;;  %v1183_v14 = vpop.f32.mrb[3].mxu1 }
  0xee   : > { %v1170_v8 = vpop.f32.mrb[1].mxu0  ;;  %v330_v9 = vadd.f32 %v329_v7, %v262_v6 }
  0xef   : > { %v265_v11 = vpop.f32.mrb[2].mxu0 }
  0xf0   : > { %v1171_v13 = vpop.f32.mrb[3].mxu0 }
  0xfa   : > { %v489_v16 = vpop.f32.mrb[4].mxu1 }
  0xfb   : > { %v1206_v19 = vpop.f32.mrb[5].mxu1 }
  0xfc   : > { %v492_v1 = vpop.f32.mrb[6].mxu1 }
  0xfd   : > { %v410_v15 = vpop.f32.mrb[4].mxu0  ;;  %v1207_v23 = vpop.f32.mrb[7].mxu1 }
  0xfe   : > { %v416_v17 = vadd.f32 %v410_v15, %v330_v9  ;;  %v1194_v18 = vpop.f32.mrb[5].mxu0 }
  0xff   : > { %v413_v20 = vpop.f32.mrb[6].mxu0 }
 0x100   : > { %v495_v21 = vadd.f32 %v489_v16, %v416_v17  ;;  %v1195_v22 = vpop.f32.mrb[7].mxu0 }
 0x10a   : > { %v662_v25 = vpop.f32.mrb[8].mxu1 }
 0x10b   : > { %v1230_v28 = vpop.f32.mrb[9].mxu1 }
 0x10c   : > { %v665_v30 = vpop.f32.mrb[10].mxu1 }
 0x10d   : > { %v580_v24 = vpop.f32.mrb[8].mxu0  ;;  %v1231_v33 = vpop.f32.mrb[11].mxu1 }
 0x10e   : > { %v586_v26 = vadd.f32 %v580_v24, %v495_v21  ;;  %v1218_v27 = vpop.f32.mrb[9].mxu0 }
 0x10f   : > { %v583_v29 = vpop.f32.mrb[10].mxu0 }
 0x110   : > { %v668_v31 = vadd.f32 %v662_v25, %v586_v26  ;;  %v1219_v32 = vpop.f32.mrb[11].mxu0 }
 0x11a   : > { %v832_v35 = vpop.f32.mrb[12].mxu1 }
 0x11b   : > { %v1254_v38 = vpop.f32.mrb[13].mxu1 }
 0x11c   : > { %v835_v40 = vpop.f32.mrb[14].mxu1 }
 0x11d   : > { %v741_v34 = vpop.f32.mrb[12].mxu0  ;;  %v1255_v43 = vpop.f32.mrb[15].mxu1 }
 0x11e   : > { %v747_v36 = vadd.f32 %v741_v34, %v668_v31  ;;  %v1242_v37 = vpop.f32.mrb[13].mxu0 }
 0x11f   : > { %v744_v39 = vpop.f32.mrb[14].mxu0 }
 0x120   : > { %v838_v41 = vadd.f32 %v832_v35, %v747_v36  ;;  %v1243_v42 = vpop.f32.mrb[15].mxu0 }
 0x12d   : > { %v914_v45 = vpop.f32.mrb[16].mxu0 }
 0x12e   : > { %v920_v46 = vadd.f32 %v914_v45, %v838_v41  ;;  %v1266_v47 = vpop.f32.mrb[17].mxu0 }
 0x12f   : > { %v917_v48 = vpop.f32.mrb[18].mxu0 }
 0x130   : > { %v927_v49 = vadd.f32 %v1112_v44, %v920_v46  ;;  %v1267_v50 = vpop.f32.mrb[19].mxu0 }
 0x132   : > { %v928_v51 = vmax.f32 %v927_v49, 0.0 }
 0x134   : > { %v929_v53 = vpack.c.bf16 %v928_v51, %v928_v51 }
 0x136   : > { %v934_v54 = vsel %vm932_vm4, %v929_v53, %v933_v52 }
 0x137   : > { %935 = vst [vmem:[%s166_s20] sm:$0x1] %v934_v54 }
 0x138 PF: > { %s13_s12 = sadd.s32 1, %s1327_s12  }
 0x139   : > { %p10_p4 = scmp.ge.s32.totalorder %s13_s12, 4  }
 0x13b   :  { %12 = sbr.rel (!%p10_p4) target bundleno = 1 (0x1), region = 72 }

// kernel: nature_cnn_forward.7
= control target key start
LH: loop header
LB: loop body
LE: loop exit
PB: predicated region body
PF: predicated region fallthrough
CT: control target
= control target key end

     0   :  { %v734_v1 = vmov 0   ;;  %vm140_vm0 = vcmask 523264   ;;  %v40_v50 = vlaneseq  ;;  %s921_s1 = inlined_call_operand.vmem [shape: bf16[64,512], index: 1, kind: input, shape index: {}]   ;;  %s922_s3 = inlined_call_operand.vmem [shape: bf16[512,128], index: 3, kind: input, shape index: {}]   ;;  %s923_s0 = inlined_call_operand.vmem [shape: bf16[8,64], index: 0, kind: input, shape index: {}]   ;;  %s924_s2 = inlined_call_operand.vmem [shape: f32[1,512], index: 2, kind: input, shape index: {}]   ;;  %s925_s4 = inlined_call_operand.vmem [shape: f32[1,128], index: 4, kind: input, shape index: {}]   ;;  %s926_s5 = inlined_call_operand.vmem [shape: f32[8,128], index: 5, kind: output, shape index: {}]  }
   0x1   :  { %v678_v0 = vld [vmem:[%s921_s1 + $0x4] ss:$16 sps:$4 sm:$0xff]   ;;  %176 = vmatprep.mubr.bf16.mxu0 %v734_v1  ;;  %217 = vmatprep.mubr.bf16.mxu1 %v734_v1  ;;  %v680_v2 = vld [vmem:[%s921_s1 + $0xc] ss:$16 sps:$4 sm:$0xff]   ;;  %v682_v3 = vld [vmem:[%s921_s1] ss:$16 sps:$4 sm:$0xff]  }
   0x2   :  { %144 = vmatprep.subr.bf16.mxu0 %v678_v0  ;;  %v683_v4 = vld [vmem:[%s921_s1 + $0x8] ss:$16 sps:$4 sm:$0xff]   ;;  %185 = vmatprep.subr.bf16.mxu1 %v680_v2  ;;  %v684_v5 = vld [vmem:[%s921_s1 + $0x24] ss:$16 sps:$4 sm:$0xff]   ;;  %v686_v6 = vld [vmem:[%s921_s1 + $0x2c] ss:$16 sps:$4 sm:$0xff]  }
   0x3   :  { %145 = vmatpush1.bf16.msra.mxu0 %v682_v3  ;;  %186 = vmatpush1.bf16.msra.mxu1 %v683_v4  ;;  %v688_v7 = vld [vmem:[%s921_s1 + $0x20] ss:$16 sps:$4 sm:$0xff]   ;;  %v689_v8 = vld [vmem:[%s921_s1 + $0x28] ss:$16 sps:$4 sm:$0xff]   ;;  %v690_v9 = vld [vmem:[%s921_s1 + $0x44] ss:$16 sps:$4 sm:$0xff]  }
   0x4   :  { %146 = vmatprep.subr.bf16.mxu0 %v684_v5  ;;  %187 = vmatprep.subr.bf16.mxu1 %v686_v6  ;;  %v692_v10 = vld [vmem:[%s921_s1 + $0x4c] ss:$16 sps:$4 sm:$0xff]   ;;  %v694_v11 = vld [vmem:[%s921_s1 + $0x40] ss:$16 sps:$4 sm:$0xff]   ;;  %v695_v12 = vld [vmem:[%s921_s1 + $0x48] ss:$16 sps:$4 sm:$0xff]  }
   0x5   :  { %v696_v13 = vld [vmem:[%s921_s1 + $0x64] ss:$16 sps:$4 sm:$0xff]   ;;  %v698_v14 = vld [vmem:[%s921_s1 + $0x6c] ss:$16 sps:$4 sm:$0xff]   ;;  %v700_v15 = vld [vmem:[%s921_s1 + $0x60] ss:$16 sps:$4 sm:$0xff]  }
   0x6   :  { %v701_v16 = vld [vmem:[%s921_s1 + $0x68] ss:$16 sps:$4 sm:$0xff]   ;;  %v702_v17 = vld [vmem:[%s922_s3 + $0x40] sm:$0xff]   ;;  %v710_v26 = vld [vmem:[%s922_s3 + $0x50] sm:$0xff]   ;;  %v41_v51 = vshrl.u32 %v40_v50, 7 }
   0x7   :  { %147 = vmatpush1.bf16.msra.mxu0 %v688_v7  ;;  %188 = vmatpush1.bf16.msra.mxu1 %v689_v8  ;;  %v703_v18 = vld [vmem:[%s922_s3 + $0xc0] sm:$0xff]   ;;  %v706_v22 = vld [vmem:[%s922_s3 + $0x48] sm:$0xff]   ;;  %v711_v27 = vld [vmem:[%s922_s3 + $0xd0] sm:$0xff]  }
   0x8   :  { %148 = vmatprep.subr.bf16.mxu0 %v690_v9  ;;  %189 = vmatprep.subr.bf16.mxu1 %v692_v10  ;;  %v21_v19 = vld [vmem:[%s923_s0] sm:$0xf]  ;;  %v707_v23 = vld [vmem:[%s922_s3 + $0xc8] sm:$0xff]   ;;  %v712_v28 = vld [vmem:[%s922_s3 + $0x10] sm:$0xff]   ;;  %v42_v52 = vsub.s32 0, %v41_v51  ;;  %v50_v53 = vsub.s32 2, %v41_v51 }
   0x9   :  { %v704_v20 = vld [vmem:[%s922_s3] sm:$0xff]   ;;  %v708_v24 = vld [vmem:[%s922_s3 + $0x8] sm:$0xff]   ;;  %v713_v29 = vld [vmem:[%s922_s3 + $0x90] sm:$0xff]   ;;  %v46_v55 = vsub.s32 1, %v41_v51  ;;  %v54_v56 = vsub.s32 3, %v41_v51 }
   0xa   :  { %v705_v21 = vld [vmem:[%s922_s3 + $0x80] sm:$0xff]   ;;  %v709_v25 = vld [vmem:[%s922_s3 + $0x88] sm:$0xff]   ;;  %v714_v30 = vld [vmem:[%s922_s3 + $0x58] sm:$0xff]  }
   0xb   :  { %149 = vmatpush1.bf16.msra.mxu0 %v694_v11  ;;  %190 = vmatpush1.bf16.msra.mxu1 %v695_v12  ;;  %v715_v31 = vld [vmem:[%s922_s3 + $0xd8] sm:$0xff]   ;;  %v718_v34 = vld [vmem:[%s922_s3 + $0x60] sm:$0xff]   ;;  %v722_v38 = vld [vmem:[%s922_s3 + $0x68] sm:$0xff]  }
   0xc   :  { %150 = vmatprep.subr.bf16.mxu0 %v696_v13  ;;  %191 = vmatprep.subr.bf16.mxu1 %v698_v14  ;;  %v716_v32 = vld [vmem:[%s922_s3 + $0x18] sm:$0xff]   ;;  %v719_v35 = vld [vmem:[%s922_s3 + $0xe0] sm:$0xff]   ;;  %v723_v39 = vld [vmem:[%s922_s3 + $0xe8] sm:$0xff]  }
   0xd   :  { %v717_v33 = vld [vmem:[%s922_s3 + $0x98] sm:$0xff]   ;;  %v720_v36 = vld [vmem:[%s922_s3 + $0x20] sm:$0xff]   ;;  %v724_v40 = vld [vmem:[%s922_s3 + $0x28] sm:$0xff]  }
   0xe   :  { %v721_v37 = vld [vmem:[%s922_s3 + $0xa0] sm:$0xff]   ;;  %v725_v41 = vld [vmem:[%s922_s3 + $0xa8] sm:$0xff]   ;;  %v726_v42 = vld [vmem:[%s922_s3 + $0x70] sm:$0xff]  }
   0xf   :  { %151 = vmatpush1.bf16.msra.mxu0 %v700_v15  ;;  %192 = vmatpush1.bf16.msra.mxu1 %v701_v16  ;;  %v727_v43 = vld [vmem:[%s922_s3 + $0xf0] sm:$0xff]   ;;  %v730_v46 = vld [vmem:[%s922_s3 + $0x78] sm:$0xff]   ;;  %v38_v54 = vld [vmem:[%s924_s2] sm:$0xf] }
  0x10   :  { %633 = vmatprep.subr.bf16.mxu0 %v702_v17  ;;  %655 = vmatprep.subr.bf16.mxu1 %v703_v18  ;;  %v728_v44 = vld [vmem:[%s922_s3 + $0x30] sm:$0xff]   ;;  %v731_v47 = vld [vmem:[%s922_s3 + $0xf8] sm:$0xff]   ;;  %v43_v57 = vrot.slane %v38_v54, %v42_v52  ;;  %v51_v58 = vrot.slane %v38_v54, %v50_v53  ;;  %v47_v59 = vrot.slane %v38_v54, %v46_v55 }
  0x11   :  { %v729_v45 = vld [vmem:[%s922_s3 + $0xb0] sm:$0xff]   ;;  %v732_v48 = vld [vmem:[%s922_s3 + $0x38] sm:$0xff]   ;;  %v55_v60 = vrot.slane %v38_v54, %v54_v56 }
  0x12   :  { %598 = vmatmul.mubr.msk.bf16.vlgmr.msra.gmra.mrb[0].mxu0 %vm140_vm0, %v21_v19  ;;  %599 = vmatmul.mubr.msk.bf16.vlgmr.msra.gmra.mrb[0].mxu1 %vm140_vm0, %v21_v19  ;;  %v733_v49 = vld [vmem:[%s922_s3 + $0xb8] sm:$0xff]   ;;  %v600_v19 = vld [vmem:[%s925_s4] ss:$0 sm:$0xff] }
  0x13   :  { %634 = vmatpush3.bf16.msra.mxu0 %v704_v20  ;;  %656 = vmatpush3.bf16.msra.mxu1 %v705_v21 }
  0x14   :  { %635 = vmatprep.subr.bf16.mxu0 %v706_v22  ;;  %657 = vmatprep.subr.bf16.mxu1 %v707_v23 }
  0x17   :  { %636 = vmatpush3.bf16.msra.mxu0 %v708_v24  ;;  %658 = vmatpush3.bf16.msra.mxu1 %v709_v25 }
  0x18   :  { %637 = vmatprep.subr.bf16.mxu0 %v710_v26  ;;  %659 = vmatprep.subr.bf16.mxu1 %v711_v27 }
  0x1b   :  { %638 = vmatpush3.bf16.msra.mxu0 %v712_v28  ;;  %660 = vmatpush3.bf16.msra.mxu1 %v713_v29 }
  0x1c   :  { %639 = vmatprep.subr.bf16.mxu0 %v714_v30  ;;  %661 = vmatprep.subr.bf16.mxu1 %v715_v31 }
  0x1f   :  { %640 = vmatpush3.bf16.msra.mxu0 %v716_v32  ;;  %662 = vmatpush3.bf16.msra.mxu1 %v717_v33 }
  0x20   :  { %641 = vmatprep.subr.bf16.mxu0 %v718_v34  ;;  %663 = vmatprep.subr.bf16.mxu1 %v719_v35 }
  0x23   :  { %642 = vmatpush3.bf16.msra.mxu0 %v720_v36  ;;  %664 = vmatpush3.bf16.msra.mxu1 %v721_v37 }
  0x24   :  { %643 = vmatprep.subr.bf16.mxu0 %v722_v38  ;;  %665 = vmatprep.subr.bf16.mxu1 %v723_v39 }
  0x27   :  { %644 = vmatpush3.bf16.msra.mxu0 %v724_v40  ;;  %666 = vmatpush3.bf16.msra.mxu1 %v725_v41 }
  0x28   :  { %645 = vmatprep.subr.bf16.mxu0 %v726_v42  ;;  %667 = vmatprep.subr.bf16.mxu1 %v727_v43 }
  0x2b   :  { %646 = vmatpush3.bf16.msra.mxu0 %v728_v44  ;;  %668 = vmatpush3.bf16.msra.mxu1 %v729_v45 }
  0x2c   :  { %647 = vmatprep.subr.bf16.mxu0 %v730_v46  ;;  %669 = vmatprep.subr.bf16.mxu1 %v731_v47 }
  0x2f   :  { %648 = vmatpush3.bf16.msra.mxu0 %v732_v48  ;;  %670 = vmatpush3.bf16.msra.mxu1 %v733_v49 }
  0xe5   :  { %v178_v61 = vpop.f32.mrb[0].mxu0  ;;  %v219_v62 = vpop.f32.mrb[0].mxu1 }
  0xe6   :  { %v179_v63 = vadd.f32 %v178_v61, %v43_v57  ;;  %v220_v0 = vadd.f32 %v219_v62, %v51_v58  ;;  %v180_v1 = vpop.f32.mrb[1].mxu0  ;;  %v221_v2 = vpop.f32.mrb[1].mxu1 }
  0xe7   :  { %v181_v3 = vadd.f32 %v180_v1, %v47_v59  ;;  %v222_v4 = vadd.f32 %v221_v2, %v55_v60  ;;  %v182_v5 = vpop.f32.mrb[2].mxu0  ;;  %v223_v6 = vpop.f32.mrb[2].mxu1 }
  0xe8   :  { %v226_v7 = vmax.f32 %v179_v63, 0.0  ;;  %v228_v8 = vmax.f32 %v220_v0, 0.0  ;;  %v183_v9 = vpop.f32.mrb[3].mxu0  ;;  %v224_v10 = vpop.f32.mrb[3].mxu1 }
  0xe9   :  { %v227_v11 = vmax.f32 %v181_v3, 0.0  ;;  %v229_v12 = vmax.f32 %v222_v4, 0.0 }
  0xea   :  { %v232_v13 = vpack.c.bf16 %v228_v8, %v228_v8  ;;  %v230_v16 = vpack.c.bf16 %v226_v7, %v226_v7 }
  0xeb   :  { %v231_v14 = vpack.c.bf16 %v227_v11, %v227_v11  ;;  %v233_v15 = vpack.c.bf16 %v229_v12, %v229_v12 }
  0xed   :  { %529 = vmatprep.mubr.bf16.mxu0 %v231_v14  ;;  %569 = vmatprep.mubr.bf16.mxu1 %v233_v15 }
  0xee   :  { %530 = vmatmul.mubr.bf16.vlgmr.msra.gmra.mrb[4].mxu0 %v230_v16  ;;  %570 = vmatmul.mubr.bf16.vlgmr.msra.gmra.mrb[4].mxu1 %v232_v13 }
 0x1c1   :  { %v649_v17 = vpop.f32.mrb[4].mxu0  ;;  %v671_v18 = vpop.f32.mrb[4].mxu1 }
 0x1c2   :  { %v650_v20 = vpop.f32.mrb[5].mxu0  ;;  %v672_v21 = vpop.f32.mrb[5].mxu1 }
 0x1c3   :  { %v651_v22 = vadd.f32 %v650_v20, %v649_v17  ;;  %v673_v23 = vadd.f32 %v672_v21, %v671_v18  ;;  %v652_v24 = vpop.f32.mrb[6].mxu0  ;;  %v674_v25 = vpop.f32.mrb[6].mxu1 }
 0x1c4   :  { %v653_v26 = vpop.f32.mrb[7].mxu0  ;;  %v675_v27 = vpop.f32.mrb[7].mxu1 }
 0x1c5   :  { %v532_v28 = vadd.f32 %v651_v22, %v600_v19 }
 0x1c7   :  { %v572_v29 = vadd.f32 %v673_v23, %v532_v28 }
 0x1c9   :  { %577 = vst [vmem:[%s926_s5] sm:$0xff] %v572_v29 }

// kernel: nature_cnn_forward.5
= control target key start
LH: loop header
LB: loop body
LE: loop exit
PB: predicated region body
PF: predicated region fallthrough
CT: control target
= control target key end

     0   :  { %s1769_s12 = smov 0   ;;  %s2090_s0 = inlined_call_operand.vmem [shape: bf16[2,8,9,128], index: 0, kind: input, shape index: {}]   ;;  %s2091_s1 = inlined_call_operand.vmem [shape: bf16[8,128,64], index: 1, kind: input, shape index: {}]   ;;  %s2092_s2 = inlined_call_operand.vmem [shape: f32[1,64], index: 2, kind: input, shape index: {}]   ;;  %s2093_s3 = inlined_call_operand.vmem [shape: bf16[2,3,3,64], index: 3, kind: output, shape index: {}]  }
   0x1 LB: > { %s1196_s13 = sadd.s32 4294967295, %s1741_s12   ;;  %p1200_p0 = scmp.ge.s32.totalorder %s1741_s12, 1  ;;  %s1741_s12 = sphi %s1769_s12, %s13_s12  }
   0x2   : > { %p137_p1 = scmp.lt.s32.totalorder %s1741_s12, 3 }
   0x4   : > { %p138_p2 = pnand %p1200_p0, %p137_p1 }
   0x5   : > { %p161_p3 = scmp.lt.s32.totalorder (!%p138_p2), %s1196_s13, 1  ;;  %v1780_v0 = vld [vmem:[%s2092_s2] ss:$0 sm:$0xff] (!%p138_p2)  ;;  %s1792_s24 = smov (!%p138_p2), 0  }
   0x6   : > { %141 = sbr.rel (%p138_p2) target bundleno = 370 (0x172), region = 32 }
   0xd   : > { %s2095_s13 = smov (!%p161_p3, %s1196_s13), 1 }
   0xe   : > { %s1406_s16 = sshll.u32 %s2095_s13, 6  ;;  %s1644_s17 = smul.u32 6, %s2095_s13 }
   0xf   : > { %s1785_s20 = scalar_lea.vmem %s2090_s0, %s1406_s16 }
  0x10   : > { %s1790_s23 = scalar_lea.vmem %s2093_s3, %s1644_s17 }
  0x11 LB: >> { %v1663_v1 = vld [vmem:[%s2091_s1 + $0x40] sm:$0xff]   ;;  %v1747_v2 = vmov 0.0   ;;  %v1665_v4 = vld [vmem:[%s2091_s1 + $0x48] sm:$0xff]   ;;  %vm1748_vm0 = vmmov 0   ;;  %v1667_v6 = vld [vmem:[%s2091_s1 + $0x50] sm:$0xff]   ;;  %s1408_s13 = sshll.u32 %s1745_s24, 4  ;;  %s1745_s24 = sphi %s1792_s24, %s178_s24  }
  0x12   : >> { %1484 = vmatprep.subr.bf16.mxu0 %v1747_v2  ;;  %1504 = vmatprep.subr.bf16.mxu1 %v1747_v2  ;;  %v1664_v3 = vld [vmem:[%s2091_s1] sm:$0xff]   ;;  %v1666_v5 = vld [vmem:[%s2091_s1 + $0x8] sm:$0xff]   ;;  %v1668_v7 = vld [vmem:[%s2091_s1 + $0x10] sm:$0xff]   ;;  %s1835_s16 = scalar_lea.vmem %s1785_s20, %s1408_s13  ;;  %vm1114_vm1 = vcmask 517120   ;;  %vm1115_vm2 = vsmask.f32 1280 }
  0x13   : >> { %1485 = vmatpush3.bf16.msra.mxu0 %v1663_v1  ;;  %1500 = vmatprep.mubr.msk.bf16.mxu0 %vm1748_vm0, %v1747_v2  ;;  %v1669_v8 = vld [vmem:[%s2091_s1 + $0x58] sm:$0xff]   ;;  %v1671_v10 = vld [vmem:[%s2091_s1 + $0x60] sm:$0xff]   ;;  %v1673_v15 = vld [vmem:[%s2091_s1 + $0x68] sm:$0xff]  }
  0x14   : >> { %1505 = vmatpush3.bf16.msra.mxu1 %v1664_v3  ;;  %1486 = vmatprep.subr.bf16.mxu0 %v1747_v2  ;;  %v1670_v9 = vld [vmem:[%s2091_s1 + $0x18] sm:$0xff]   ;;  %v1672_v11 = vld [vmem:[%s2091_s1 + $0x20] sm:$0xff]   ;;  %v1674_v16 = vld [vmem:[%s2091_s1 + $0x28] sm:$0xff]  }
  0x15   : >> { %1506 = vmatprep.subr.bf16.mxu1 %v1747_v2  ;;  %1520 = vmatprep.mubr.msk.bf16.mxu1 %vm1748_vm0, %v1747_v2  ;;  %v183_v12 = vld [vmem:[%s1835_s16] sm:$0xf]  ;;  %v200_v13 = vld [vmem:[%s1835_s16 + $0x4] sm:$0x1]  ;;  %v1675_v18 = vld [vmem:[%s2091_s1 + $0x70] sm:$0xff]  }
  0x16   : >> { %v1223_v14 = vcombine.low %v183_v12, %v200_v13  ;;  %v1676_v19 = vld [vmem:[%s2091_s1 + $0x30] sm:$0xff]   ;;  %v1677_v22 = vld [vmem:[%s2091_s1 + $0x78] sm:$0xff]   ;;  %v1680_v25 = vld [vmem:[%s2091_s1 + $0x80] sm:$0xff]  }
  0x17   : >> { %1487 = vmatpush3.bf16.msra.mxu0 %v1665_v4  ;;  %v1678_v23 = vld [vmem:[%s2091_s1 + $0x38] sm:$0xff]   ;;  %v1681_v26 = vld [vmem:[%s2091_s1 + $0xc0] sm:$0xff]   ;;  %v1682_v27 = vld [vmem:[%s2091_s1 + $0x88] sm:$0xff]  }
  0x18   : >> { %1507 = vmatpush3.bf16.msra.mxu1 %v1666_v5  ;;  %1488 = vmatprep.subr.bf16.mxu0 %v1747_v2  ;;  %v226_v17 = vshll.u32 %v1223_v14, 16  ;;  %v224_v20 = vshrl.u32 %v1223_v14, 16  ;;  %v1683_v28 = vld [vmem:[%s2091_s1 + $0xc8] sm:$0xff]   ;;  %v1684_v29 = vld [vmem:[%s2091_s1 + $0x90] sm:$0xff]   ;;  %v1686_v31 = vld [vmem:[%s2091_s1 + $0x98] sm:$0xff]  }
  0x19   : >> { %1508 = vmatprep.subr.bf16.mxu1 %v1747_v2  ;;  %v1685_v30 = vld [vmem:[%s2091_s1 + $0xd0] sm:$0xff]   ;;  %v1687_v32 = vld [vmem:[%s2091_s1 + $0xd8] sm:$0xff]   ;;  %v1688_v33 = vld [vmem:[%s2091_s1 + $0xa0] sm:$0xff]  }
  0x1a   : >> { %v228_v21 = vrot.slane %v226_v17, 1  ;;  %v1689_v34 = vld [vmem:[%s2091_s1 + $0xe0] sm:$0xff]   ;;  %v1696_v35 = vld [vmem:[%s1835_s16 + $0x8] sm:$0x1f]   ;;  %v1692_v38 = vld [vmem:[%s2091_s1 + $0xb0] sm:$0xff]  }
  0x1b   : >> { %1489 = vmatpush3.bf16.msra.mxu0 %v1667_v6  ;;  %v1690_v36 = vld [vmem:[%s2091_s1 + $0xa8] sm:$0xff]   ;;  %v545_v39 = vshll.u32 %v1696_v35, 16  ;;  %v1693_v40 = vld [vmem:[%s2091_s1 + $0xf0] sm:$0xff]   ;;  %v1694_v41 = vld [vmem:[%s2091_s1 + $0xb8] sm:$0xff]   ;;  %v543_v42 = vshrl.u32 %v1696_v35, 16 }
  0x1c   : >> { %1509 = vmatpush3.bf16.msra.mxu1 %v1668_v7  ;;  %1490 = vmatprep.subr.bf16.mxu0 %v1747_v2  ;;  %v229_v24 = vor.u32 %v228_v21, %v224_v20  ;;  %v1691_v37 = vld [vmem:[%s2091_s1 + $0xe8] sm:$0xff]   ;;  %v1695_v44 = vld [vmem:[%s2091_s1 + $0xf8] sm:$0xff]   ;;  %v1697_v47 = vld [vmem:[%s2091_s1 + $0x100] sm:$0xff]  }
  0x1d   : >> { %1510 = vmatprep.subr.bf16.mxu1 %v1747_v2  ;;  %v547_v43 = vrot.slane %v545_v39, 1  ;;  %v1242_v45 = vld [vmem:[%s1835_s16 + $0x8] sm:$0xf]  ;;  %v1698_v48 = vld [vmem:[%s2091_s1 + $0x140] sm:$0xff]   ;;  %v1701_v51 = vld [vmem:[%s2091_s1 + $0x110] sm:$0xff]  }
  0x1e   : >> { %v1699_v49 = vld [vmem:[%s2091_s1 + $0x108] sm:$0xff]   ;;  %v1702_v52 = vld [vmem:[%s2091_s1 + $0x150] sm:$0xff]   ;;  %v1703_v53 = vld [vmem:[%s2091_s1 + $0x118] sm:$0xff]  }
  0x1f   : >> { %1491 = vmatpush3.bf16.msra.mxu0 %v1669_v8  ;;  %v548_v46 = vor.u32 %v547_v43, %v543_v42  ;;  %v1700_v50 = vld [vmem:[%s2091_s1 + $0x148] sm:$0xff]   ;;  %v1704_v54 = vld [vmem:[%s2091_s1 + $0x158] sm:$0xff]   ;;  %v1705_v55 = vld [vmem:[%s2091_s1 + $0x120] sm:$0xff]  }
  0x20   : >> { %1511 = vmatpush3.bf16.msra.mxu1 %v1670_v9  ;;  %1492 = vmatprep.subr.bf16.mxu0 %v1747_v2  ;;  %v1706_v56 = vld [vmem:[%s2091_s1 + $0x160] sm:$0xff]   ;;  %v1707_v57 = vld [vmem:[%s2091_s1 + $0x128] sm:$0xff]   ;;  %v1713_v58 = vld [vmem:[%s1835_s16 + $0x10] sm:$0x1f]  }
  0x21   : >> { %1512 = vmatprep.subr.bf16.mxu1 %v1747_v2  ;;  %v1708_v59 = vld [vmem:[%s2091_s1 + $0x168] sm:$0xff]   ;;  %v1709_v60 = vld [vmem:[%s2091_s1 + $0x130] sm:$0xff]   ;;  %v777_v61 = vshll.u32 %v1713_v58, 16  ;;  %v1711_v63 = vld [vmem:[%s2091_s1 + $0x138] sm:$0xff]   ;;  %v775_v1 = vshrl.u32 %v1713_v58, 16 }
  0x22   : >> { %v1710_v62 = vld [vmem:[%s2091_s1 + $0x170] sm:$0xff]   ;;  %v1712_v4 = vld [vmem:[%s2091_s1 + $0x178] sm:$0xff]   ;;  %v1714_v7 = vld [vmem:[%s2091_s1 + $0x180] sm:$0xff]  }
  0x23   : >> { %1493 = vmatpush3.bf16.msra.mxu0 %v1671_v10  ;;  %v779_v3 = vrot.slane %v777_v61, 1  ;;  %v1296_v5 = vld [vmem:[%s1835_s16 + $0x10] sm:$0xf]  ;;  %v1715_v8 = vld [vmem:[%s2091_s1 + $0x1c0] sm:$0xff]   ;;  %v1716_v9 = vld [vmem:[%s2091_s1 + $0x188] sm:$0xff]  }
  0x24   : >> { %1513 = vmatpush3.bf16.msra.mxu1 %v1672_v11  ;;  %1494 = vmatprep.subr.bf16.mxu0 %v1747_v2  ;;  %v1717_v10 = vld [vmem:[%s2091_s1 + $0x1c8] sm:$0xff]   ;;  %v1718_v11 = vld [vmem:[%s2091_s1 + $0x190] sm:$0xff]   ;;  %v1720_v13 = vld [vmem:[%s2091_s1 + $0x198] sm:$0xff]  }
  0x25   : >> { %1514 = vmatprep.subr.bf16.mxu1 %v1747_v2  ;;  %v780_v6 = vor.u32 %v779_v3, %v775_v1  ;;  %v1721_v14 = vld [vmem:[%s2091_s1 + $0x1d8] sm:$0xff]   ;;  %v1724_v17 = vld [vmem:[%s2091_s1 + $0x1a8] sm:$0xff]   ;;  %v1726_v20 = vld [vmem:[%s2091_s1 + $0x1b0] sm:$0xff]  }
  0x26   : >> { %vm1116_vm3 = vmand %vm1114_vm1, %vm1115_vm2 }
  0x27   : >> { %1495 = vmatpush3.bf16.msra.mxu0 %v1673_v15  ;;  %v1722_v15 = vld [vmem:[%s2091_s1 + $0x1a0] sm:$0xff]  }
  0x28   : >> { %1515 = vmatpush3.bf16.msra.mxu1 %v1674_v16  ;;  %1496 = vmatprep.subr.bf16.mxu0 %v1747_v2  ;;  %v1723_v16 = vld [vmem:[%s2091_s1 + $0x1e0] sm:$0xff]  }
  0x29   : >> { %1516 = vmatprep.subr.bf16.mxu1 %v1747_v2 }
  0x2b   : >> { %1497 = vmatpush3.bf16.msra.mxu0 %v1675_v18  ;;  %v1730_v18 = vld [vmem:[%s1835_s16 + $0x18] sm:$0x1f]  }
  0x2c   : >> { %1517 = vmatpush3.bf16.msra.mxu1 %v1676_v19  ;;  %1498 = vmatprep.subr.bf16.mxu0 %v1747_v2  ;;  %v1725_v19 = vld [vmem:[%s2091_s1 + $0x1e8] sm:$0xff]   ;;  %v1009_v21 = vshll.u32 %v1730_v18, 16 }
  0x2d   : >> { %1518 = vmatprep.subr.bf16.mxu1 %v1747_v2 }
  0x2f   : >> { %1499 = vmatpush3.bf16.msra.mxu0 %v1677_v22  ;;  %v1727_v22 = vld [vmem:[%s2091_s1 + $0x1f0] sm:$0xff]  }
  0x30   : >> { %1519 = vmatpush3.bf16.msra.mxu1 %v1678_v23  ;;  %1524 = vmatprep.subr.bf16.mxu0 %v1747_v2  ;;  %v1728_v23 = vld [vmem:[%s2091_s1 + $0x1b8] sm:$0xff]  }
  0x31   : >> { %1544 = vmatprep.subr.bf16.mxu1 %v1747_v2 }
  0x32   : >> { %1501 = vmatmul.mubr.bf16.vlgmr.msra.gmra.mrb[0].mxu0 %v229_v24  ;;  %v1007_v24 = vshrl.u32 %v1730_v18, 16 }
  0x33   : >> { %1521 = vmatmul.mubr.bf16.vlgmr.msra.gmra.mrb[0].mxu1 %v183_v12  ;;  %1525 = vmatpush3.bf16.msra.mxu0 %v1680_v25  ;;  %v1719_v12 = vld [vmem:[%s2091_s1 + $0x1d0] sm:$0xff]   ;;  %v1011_v25 = vrot.slane %v1009_v21, 1 }
  0x34   : >> { %1545 = vmatpush3.bf16.msra.mxu1 %v1681_v26  ;;  %1526 = vmatprep.subr.bf16.mxu0 %v1747_v2  ;;  %v1729_v26 = vld [vmem:[%s2091_s1 + $0x1f8] sm:$0xff]  }
  0x35   : >> { %1546 = vmatprep.subr.bf16.mxu1 %v1747_v2  ;;  %1540 = vmatprep.mubr.msk.bf16.mxu0 %vm1748_vm0, %v1747_v2 }
  0x36   : >> { %1560 = vmatprep.mubr.msk.bf16.mxu1 %vm1748_vm0, %v1747_v2 }
  0x37   : >> { %1527 = vmatpush3.bf16.msra.mxu0 %v1682_v27  ;;  %v1350_v27 = vld [vmem:[%s1835_s16 + $0x18] sm:$0xf]  ;;  %s1403_s16 = sshll.u32 %s1745_s24, 1  ;;  %s178_s24 = sadd.s32 1, %s1745_s24  }
  0x38   : >> { %1547 = vmatpush3.bf16.msra.mxu1 %v1683_v28  ;;  %1528 = vmatprep.subr.bf16.mxu0 %v1747_v2  ;;  %v1012_v28 = vor.u32 %v1011_v25, %v1007_v24  ;;  %s1113_s19 = scalar_lea.vmem %s1790_s23, %s1403_s16  ;;  %p175_p4 = scmp.ge.s32.totalorder %s178_s24, 3  }
  0x39   : >> { %1548 = vmatprep.subr.bf16.mxu1 %v1747_v2 }
  0x3b   : >> { %1529 = vmatpush3.bf16.msra.mxu0 %v1684_v29 }
  0x3c   : >> { %1549 = vmatpush3.bf16.msra.mxu1 %v1685_v30  ;;  %1530 = vmatprep.subr.bf16.mxu0 %v1747_v2 }
  0x3d   : >> { %1550 = vmatprep.subr.bf16.mxu1 %v1747_v2 }
  0x3f   : >> { %1531 = vmatpush3.bf16.msra.mxu0 %v1686_v31 }
  0x40   : >> { %1551 = vmatpush3.bf16.msra.mxu1 %v1687_v32  ;;  %1532 = vmatprep.subr.bf16.mxu0 %v1747_v2 }
  0x41   : >> { %1552 = vmatprep.subr.bf16.mxu1 %v1747_v2 }
  0x43   : >> { %1533 = vmatpush3.bf16.msra.mxu0 %v1688_v33 }
  0x44   : >> { %1553 = vmatpush3.bf16.msra.mxu1 %v1689_v34  ;;  %1534 = vmatprep.subr.bf16.mxu0 %v1747_v2 }
  0x45   : >> { %1554 = vmatprep.subr.bf16.mxu1 %v1747_v2 }
  0x47   : >> { %1535 = vmatpush3.bf16.msra.mxu0 %v1690_v36 }
  0x48   : >> { %1555 = vmatpush3.bf16.msra.mxu1 %v1691_v37  ;;  %1536 = vmatprep.subr.bf16.mxu0 %v1747_v2 }
  0x49   : >> { %1556 = vmatprep.subr.bf16.mxu1 %v1747_v2 }
  0x4b   : >> { %1537 = vmatpush3.bf16.msra.mxu0 %v1692_v38 }
  0x4c   : >> { %1557 = vmatpush3.bf16.msra.mxu1 %v1693_v40  ;;  %1538 = vmatprep.subr.bf16.mxu0 %v1747_v2 }
  0x4d   : >> { %1558 = vmatprep.subr.bf16.mxu1 %v1747_v2 }
  0x4f   : >> { %1539 = vmatpush3.bf16.msra.mxu0 %v1694_v41 }
  0x50   : >> { %1559 = vmatpush3.bf16.msra.mxu1 %v1695_v44  ;;  %1564 = vmatprep.subr.bf16.mxu0 %v1747_v2 }
  0x51   : >> { %1584 = vmatprep.subr.bf16.mxu1 %v1747_v2 }
  0x52   : >> { %1541 = vmatmul.mubr.bf16.vlgmr.msra.gmra.mrb[4].mxu0 %v1242_v45 }
  0x53   : >> { %1561 = vmatmul.mubr.bf16.vlgmr.msra.gmra.mrb[4].mxu1 %v548_v46  ;;  %1565 = vmatpush3.bf16.msra.mxu0 %v1697_v47 }
  0x54   : >> { %1585 = vmatpush3.bf16.msra.mxu1 %v1698_v48  ;;  %1566 = vmatprep.subr.bf16.mxu0 %v1747_v2 }
  0x55   : >> { %1586 = vmatprep.subr.bf16.mxu1 %v1747_v2  ;;  %1580 = vmatprep.mubr.msk.bf16.mxu0 %vm1748_vm0, %v1747_v2 }
  0x56   : >> { %1600 = vmatprep.mubr.msk.bf16.mxu1 %vm1748_vm0, %v1747_v2 }
  0x57   : >> { %1567 = vmatpush3.bf16.msra.mxu0 %v1699_v49 }
  0x58   : >> { %1587 = vmatpush3.bf16.msra.mxu1 %v1700_v50  ;;  %1568 = vmatprep.subr.bf16.mxu0 %v1747_v2 }
  0x59   : >> { %1588 = vmatprep.subr.bf16.mxu1 %v1747_v2 }
  0x5b   : >> { %1569 = vmatpush3.bf16.msra.mxu0 %v1701_v51 }
  0x5c   : >> { %1589 = vmatpush3.bf16.msra.mxu1 %v1702_v52  ;;  %1570 = vmatprep.subr.bf16.mxu0 %v1747_v2 }
  0x5d   : >> { %1590 = vmatprep.subr.bf16.mxu1 %v1747_v2 }
  0x5f   : >> { %1571 = vmatpush3.bf16.msra.mxu0 %v1703_v53 }
  0x60   : >> { %1591 = vmatpush3.bf16.msra.mxu1 %v1704_v54  ;;  %1572 = vmatprep.subr.bf16.mxu0 %v1747_v2 }
  0x61   : >> { %1592 = vmatprep.subr.bf16.mxu1 %v1747_v2 }
  0x63   : >> { %1573 = vmatpush3.bf16.msra.mxu0 %v1705_v55 }
  0x64   : >> { %1593 = vmatpush3.bf16.msra.mxu1 %v1706_v56  ;;  %1574 = vmatprep.subr.bf16.mxu0 %v1747_v2 }
  0x65   : >> { %1594 = vmatprep.subr.bf16.mxu1 %v1747_v2 }
  0x67   : >> { %1575 = vmatpush3.bf16.msra.mxu0 %v1707_v57 }
  0x68   : >> { %1595 = vmatpush3.bf16.msra.mxu1 %v1708_v59  ;;  %1576 = vmatprep.subr.bf16.mxu0 %v1747_v2 }
  0x69   : >> { %1596 = vmatprep.subr.bf16.mxu1 %v1747_v2 }
  0x6b   : >> { %1577 = vmatpush3.bf16.msra.mxu0 %v1709_v60 }
  0x6c   : >> { %1597 = vmatpush3.bf16.msra.mxu1 %v1710_v62  ;;  %1578 = vmatprep.subr.bf16.mxu0 %v1747_v2 }
  0x6d   : >> { %1598 = vmatprep.subr.bf16.mxu1 %v1747_v2 }
  0x6f   : >> { %1579 = vmatpush3.bf16.msra.mxu0 %v1711_v63 }
  0x70   : >> { %1599 = vmatpush3.bf16.msra.mxu1 %v1712_v4  ;;  %1604 = vmatprep.subr.bf16.mxu0 %v1747_v2 }
  0x71   : >> { %1624 = vmatprep.subr.bf16.mxu1 %v1747_v2 }
  0x72   : >> { %1581 = vmatmul.mubr.bf16.vlgmr.msra.gmra.mrb[8].mxu0 %v1296_v5 }
  0x73   : >> { %1601 = vmatmul.mubr.bf16.vlgmr.msra.gmra.mrb[8].mxu1 %v780_v6  ;;  %1605 = vmatpush3.bf16.msra.mxu0 %v1714_v7  ;;  %v1117_v7 = vld [vmem:[%s1113_s19] sm:$0x3] }
  0x74   : >> { %1625 = vmatpush3.bf16.msra.mxu1 %v1715_v8  ;;  %1606 = vmatprep.subr.bf16.mxu0 %v1747_v2 }
  0x75   : >> { %1626 = vmatprep.subr.bf16.mxu1 %v1747_v2  ;;  %1620 = vmatprep.mubr.msk.bf16.mxu0 %vm1748_vm0, %v1747_v2 }
  0x76   : >> { %1640 = vmatprep.mubr.msk.bf16.mxu1 %vm1748_vm0, %v1747_v2 }
  0x77   : >> { %1607 = vmatpush3.bf16.msra.mxu0 %v1716_v9 }
  0x78   : >> { %1627 = vmatpush3.bf16.msra.mxu1 %v1717_v10  ;;  %1608 = vmatprep.subr.bf16.mxu0 %v1747_v2 }
  0x79   : >> { %1628 = vmatprep.subr.bf16.mxu1 %v1747_v2 }
  0x7b   : >> { %1609 = vmatpush3.bf16.msra.mxu0 %v1718_v11 }
  0x7c   : >> { %1629 = vmatpush3.bf16.msra.mxu1 %v1719_v12  ;;  %1610 = vmatprep.subr.bf16.mxu0 %v1747_v2 }
  0x7d   : >> { %1630 = vmatprep.subr.bf16.mxu1 %v1747_v2 }
  0x7f   : >> { %1611 = vmatpush3.bf16.msra.mxu0 %v1720_v13 }
  0x80   : >> { %1631 = vmatpush3.bf16.msra.mxu1 %v1721_v14  ;;  %1612 = vmatprep.subr.bf16.mxu0 %v1747_v2 }
  0x81   : >> { %1632 = vmatprep.subr.bf16.mxu1 %v1747_v2 }
  0x83   : >> { %1613 = vmatpush3.bf16.msra.mxu0 %v1722_v15 }
  0x84   : >> { %1633 = vmatpush3.bf16.msra.mxu1 %v1723_v16  ;;  %1614 = vmatprep.subr.bf16.mxu0 %v1747_v2 }
  0x85   : >> { %1634 = vmatprep.subr.bf16.mxu1 %v1747_v2 }
  0x87   : >> { %1615 = vmatpush3.bf16.msra.mxu0 %v1724_v17 }
  0x88   : >> { %1635 = vmatpush3.bf16.msra.mxu1 %v1725_v19  ;;  %1616 = vmatprep.subr.bf16.mxu0 %v1747_v2 }
  0x89   : >> { %1636 = vmatprep.subr.bf16.mxu1 %v1747_v2 }
  0x8b   : >> { %1617 = vmatpush3.bf16.msra.mxu0 %v1726_v20 }
  0x8c   : >> { %1637 = vmatpush3.bf16.msra.mxu1 %v1727_v22  ;;  %1618 = vmatprep.subr.bf16.mxu0 %v1747_v2 }
  0x8d   : >> { %1638 = vmatprep.subr.bf16.mxu1 %v1747_v2 }
  0x8f   : >> { %1619 = vmatpush3.bf16.msra.mxu0 %v1728_v23 }
  0x90   : >> { %1639 = vmatpush3.bf16.msra.mxu1 %v1729_v26 }
  0x92   : >> { %1621 = vmatmul.mubr.bf16.vlgmr.msra.gmra.mrb[12].mxu0 %v1350_v27 }
  0x93   : >> { %1641 = vmatmul.mubr.bf16.vlgmr.msra.gmra.mrb[12].mxu1 %v1012_v28 }
 0x105   : >> { %v313_v29 = vpop.f32.mrb[0].mxu0 }
 0x106   : >> { %v401_v30 = vpop.f32.mrb[0].mxu1  ;;  %v1502_v31 = vpop.f32.mrb[1].mxu0 }
 0x107   : >> { %v402_v32 = vadd.f32 %v401_v30, %v313_v29  ;;  %v1522_v33 = vpop.f32.mrb[1].mxu1  ;;  %v316_v34 = vpop.f32.mrb[2].mxu0 }
 0x108   : >> { %v404_v35 = vpop.f32.mrb[2].mxu1  ;;  %v1503_v36 = vpop.f32.mrb[3].mxu0 }
 0x109   : >> { %v1523_v37 = vpop.f32.mrb[3].mxu1 }
 0x125   : >> { %v511_v38 = vpop.f32.mrb[4].mxu0 }
 0x126   : >> { %v517_v39 = vadd.f32 %v511_v38, %v402_v32  ;;  %v632_v40 = vpop.f32.mrb[4].mxu1  ;;  %v1542_v41 = vpop.f32.mrb[5].mxu0 }
 0x127   : >> { %v1562_v2 = vpop.f32.mrb[5].mxu1  ;;  %v514_v42 = vpop.f32.mrb[6].mxu0 }
 0x128   : >> { %v638_v43 = vadd.f32 %v632_v40, %v517_v39  ;;  %v635_v44 = vpop.f32.mrb[6].mxu1  ;;  %v1543_v45 = vpop.f32.mrb[7].mxu0 }
 0x129   : >> { %v1563_v46 = vpop.f32.mrb[7].mxu1 }
 0x145   : >> { %v743_v47 = vpop.f32.mrb[8].mxu0 }
 0x146   : >> { %v749_v48 = vadd.f32 %v743_v47, %v638_v43  ;;  %v864_v49 = vpop.f32.mrb[8].mxu1  ;;  %v1582_v50 = vpop.f32.mrb[9].mxu0 }
 0x147   : >> { %v1602_v51 = vpop.f32.mrb[9].mxu1  ;;  %v746_v52 = vpop.f32.mrb[10].mxu0 }
 0x148   : >> { %v870_v53 = vadd.f32 %v864_v49, %v749_v48  ;;  %v867_v54 = vpop.f32.mrb[10].mxu1  ;;  %v1583_v55 = vpop.f32.mrb[11].mxu0 }
 0x149   : >> { %v1603_v56 = vpop.f32.mrb[11].mxu1 }
 0x165   : >> { %v975_v57 = vpop.f32.mrb[12].mxu0 }
 0x166   : >> { %v981_v58 = vadd.f32 %v975_v57, %v870_v53  ;;  %v1096_v59 = vpop.f32.mrb[12].mxu1  ;;  %v1622_v60 = vpop.f32.mrb[13].mxu0 }
 0x167   : >> { %v1642_v61 = vpop.f32.mrb[13].mxu1  ;;  %v978_v62 = vpop.f32.mrb[14].mxu0 }
 0x168   : >> { %v1102_v63 = vadd.f32 %v1096_v59, %v981_v58  ;;  %v1099_v1 = vpop.f32.mrb[14].mxu1  ;;  %v1623_v3 = vpop.f32.mrb[15].mxu0 }
 0x169   : >> { %v1643_v4 = vpop.f32.mrb[15].mxu1 }
 0x16a   : >> { %v1109_v5 = vadd.f32 %v1780_v0, %v1102_v63 }
 0x16b   : > { %177 = sbr.rel (!%p175_p4) target bundleno = 17 (0x11), region = 81 }
 0x16c   : >> { %v1110_v6 = vmax.f32 %v1109_v5, 0.0 }
 0x16e   : >> { %v1111_v8 = vpack.c.bf16 %v1110_v6, %v1110_v6 }
 0x170   : >> { %v1118_v9 = vsel %vm1116_vm3, %v1111_v8, %v1117_v7 }
 0x171   : >> { %1119 = vst [vmem:[%s1113_s19] sm:$0x3] %v1118_v9 }
 0x172 PF: > { %s13_s12 = sadd.s32 1, %s1741_s12  }
 0x173   : > { %p10_p5 = scmp.ge.s32.totalorder %s13_s12, 4  }
 0x175   :  { %12 = sbr.rel (!%p10_p5) target bundleno = 1 (0x1), region = 92 }

</bundles_post_ra>
